<compile_context>
chip_gen: v7x
topology: tpu7x:2x2x1
jax: 0.10.0
libtpu: 0.0.40
codegen_flags: <defaults>
</compile_context>

<pallas_src>
import functools
import math

import jax
import jax.numpy as jnp
from jax.experimental import pallas as pl
from jax.experimental.pallas import tpu as pltpu

_MASK_VALUE = -1e30  # finite "minus infinity" for masked (padded) keys


# ----------------------------------------------------------------------------
# Kernel 1: fused Q/K/V input projections (hoisted out of the attention loop).
# ----------------------------------------------------------------------------
def _proj_kernel(xq_ref, xk_ref, xv_ref,
                 wq_ref, bq_ref, wk_ref, bk_ref, wv_ref, bv_ref,
                 qh_ref, kh_ref, vh_ref, *, num_heads, head_dim):
    H, Dh = num_heads, head_dim

    def proj(x_ref, w_ref, b_ref, o_ref):
        x = x_ref[0]                                            # (TS, E), input dtype
        p = jnp.dot(x, w_ref[...],
                    preferred_element_type=jnp.float32) + b_ref[...]
        p = p.astype(o_ref.dtype)
        ts = x.shape[0]
        # Head split done ONCE per position (amortized over the whole kernel),
        # never repeated per query/kv tile in the attention loop.
        o_ref[0] = jnp.swapaxes(p.reshape(ts, H, Dh), 0, 1)     # (H, TS, Dh)

    proj(xq_ref, wq_ref, bq_ref, qh_ref)
    proj(xk_ref, wk_ref, bk_ref, kh_ref)
    proj(xv_ref, wv_ref, bv_ref, vh_ref)


# ----------------------------------------------------------------------------
# Kernel 2: flash attention (online softmax over K/V tiles) + fused out-proj.
# ----------------------------------------------------------------------------
def _flash_attn_kernel(q_ref, k_ref, v_ref, wo_ref, bo_ref, o_ref,
                       m_sc, l_sc, acc_sc, *, kv_len, kv_len_padded, tk):
    kv = pl.program_id(2)

    @pl.when(kv == 0)
    def _():
        m_sc[...] = jnp.full_like(m_sc, _MASK_VALUE)
        l_sc[...] = jnp.zeros_like(l_sc)
        acc_sc[...] = jnp.zeros_like(acc_sc)

    q = q_ref[0]                     # (H, TQ, Dh) — 1/sqrt(Dh) pre-folded into Wq
    k = k_ref[0]                     # (H, TK, Dh)
    v = v_ref[0]                     # (H, TK, Dh)

    # All heads as one batched matmul, f32 accumulation on the MXU.
    s = jnp.einsum('hqd,hkd->hqk', q, k,
                   preferred_element_type=jnp.float32)          # (H, TQ, TK)

    if kv_len_padded != kv_len:      # static: mask padded key positions only
        col = jax.lax.broadcasted_iota(jnp.int32, s.shape, 2) + kv * tk
        s = jnp.where(col < kv_len, s, _MASK_VALUE)

    m_prev = m_sc[...]
    m_new = jnp.maximum(m_prev, jnp.max(s, axis=-1, keepdims=True))
    alpha = jnp.exp(m_prev - m_new)
    p = jnp.exp(s - m_new)
    l_sc[...] = alpha * l_sc[...] + jnp.sum(p, axis=-1, keepdims=True)
    acc_sc[...] = alpha * acc_sc[...] + jnp.einsum(
        'hqk,hkd->hqd', p.astype(v.dtype), v,
        preferred_element_type=jnp.float32)
    m_sc[...] = m_new

    @pl.when(kv == pl.num_programs(2) - 1)
    def _():
        # Exact normalization (no approx reciprocal — correctness feedback).
        ctx = acc_sc[...] / l_sc[...]                           # (H, TQ, Dh) f32
        h, tq, dh = ctx.shape
        # Merge-heads relayout is small (TQ x E) and happens once per q-tile.
        ctx2d = jnp.swapaxes(ctx, 0, 1).reshape(tq, h * dh)
        out = jnp.dot(ctx2d.astype(wo_ref.dtype), wo_ref[...],
                      preferred_element_type=jnp.float32) + bo_ref[...]
        o_ref[0] = out.astype(o_ref.dtype)


# ----------------------------------------------------------------------------
# Wrapper helpers.
# ----------------------------------------------------------------------------
def _round_up(x, m):
    return ((x + m - 1) // m) * m


def _sublane_pack(dtype):
    # 8 rows per sublane tile for 32-bit, 16 for 16-bit, 32 for 8-bit dtypes.
    return 8 * (4 // jnp.dtype(dtype).itemsize)


def _pick_tile(s, pack, target):
    """Tile length: multiple of the sublane packing, capped at `target`."""
    t = min(_round_up(target, pack), _round_up(s, pack))
    return max(t, pack)


def _vmem_limit_bytes():
    # v7x has only 64 MiB physical VMEM per TC (v5e/v6e: 128 MiB).  Never claim
    # it all — leave headroom for compiler-internal scratch.
    try:
        cap = int(pltpu.get_tpu_info().vmem_capacity_bytes)
    except Exception:
        return None
    return min((cap * 3) // 4, 100 * 1024 * 1024)


def multi_head_attention(query, key, value, params, *, num_heads,
                         q_tile=256, kv_tile=512, single_buffer_weights=True):
    B, S, E = query.shape
    assert key.shape == query.shape and value.shape == query.shape, \
        "kernel assumes query/key/value share the same (B, S, E) shape"
    head_dim = E // num_heads
    assert head_dim * num_heads == E, "embed_dim must be divisible by num_heads"

    wq, bq, wk, bk, wv, bv, wo, bo = params
    dtype = query.dtype
    w_dtype = wq.dtype
    x_isz = jnp.dtype(dtype).itemsize
    w_isz = jnp.dtype(w_dtype).itemsize
    H, Dh = num_heads, head_dim

    # ---- free wrapper-side layout plumbing --------------------------------
    scale = 1.0 / math.sqrt(Dh)
    wq_t = (wq.T * scale).astype(w_dtype)          # scale folded into Q proj
    bq_s = (bq * scale).reshape(1, E).astype(w_dtype)
    wk_t, wv_t, wo_t = wk.T, wv.T, wo.T            # (in, out) layout
    bk2, bv2, bo2 = bk.reshape(1, E), bv.reshape(1, E), bo.reshape(1, E)

    # ---- hardware-aware tiling (sublane-packed, padded S) ------------------
    pack = _sublane_pack(dtype)
    TQ = _pick_tile(S, pack, q_tile)
    TK = _pick_tile(S, pack, kv_tile)
    T = max(TQ, TK)
    S_pad = _round_up(S, T)
    TQ = T if S_pad % TQ else TQ
    TK = T if S_pad % TK else TK
    pad = S_pad - S
    if pad:
        padfn = lambda x: jnp.pad(x, ((0, 0), (0, pad), (0, 0)))
        query_p, key_p, value_p = padfn(query), padfn(key), padfn(value)
    else:
        query_p, key_p, value_p = query, key, value

    vmem_limit = _vmem_limit_bytes()

    def _const_spec(shape, index_map):
        # Constant-index weights/biases: single-buffered (no pipelining win).
        if single_buffer_weights:
            return pl.BlockSpec(shape, index_map, pipeline_mode=pl.Buffered(1))
        return pl.BlockSpec(shape, index_map)

    # ------------------------------------------------------------------ proj
    x_spec = pl.BlockSpec((1, T, E), lambda b, st: (b, st, 0))
    hsplit_spec = pl.BlockSpec((1, H, T, Dh), lambda b, st: (b, 0, st, 0))
    w_spec_p = _const_spec((E, E), lambda b, st: (0, 0))
    b_spec_p = _const_spec((1, E), lambda b, st: (0, 0))

    proj_cost = pl.CostEstimate(
        flops=6 * B * S_pad * E * E,
        transcendentals=0,
        bytes_accessed=6 * B * S_pad * E * x_isz + 3 * (E * E + E) * w_isz,
    )

    qh, kh, vh = pl.pallas_call(
        functools.partial(_proj_kernel, num_heads=H, head_dim=Dh),
        out_shape=(jax.ShapeDtypeStruct((B, H, S_pad, Dh), dtype),
                   jax.ShapeDtypeStruct((B, H, S_pad, Dh), dtype),
                   jax.ShapeDtypeStruct((B, H, S_pad, Dh), dtype)),
        grid_spec=pltpu.PrefetchScalarGridSpec(
            num_scalar_prefetch=0,
            grid=(B, S_pad // T),
            in_specs=[x_spec, x_spec, x_spec,
                      w_spec_p, b_spec_p, w_spec_p, b_spec_p, w_spec_p, b_spec_p],
            out_specs=[hsplit_spec, hsplit_spec, hsplit_spec],
        ),
        compiler_params=pltpu.CompilerParams(
            dimension_semantics=("parallel", "parallel"),
            vmem_limit_bytes=vmem_limit,
        ),
        cost_estimate=proj_cost,
    )(query_p, key_p, value_p, wq_t, bq_s, wk_t, bk2, wv_t, bv2)

    # ------------------------------------------------------------- attention
    n_q = S_pad // TQ
    n_kv = S_pad // TK

    qh_spec = pl.BlockSpec((1, H, TQ, Dh), lambda b, qt, kt: (b, 0, qt, 0))
    kv_spec = pl.BlockSpec((1, H, TK, Dh), lambda b, qt, kt: (b, 0, kt, 0))
    wo_spec = _const_spec((E, E), lambda b, qt, kt: (0, 0))
    bo_spec = _const_spec((1, E), lambda b, qt, kt: (0, 0))
    o_spec = pl.BlockSpec((1, TQ, E), lambda b, qt, kt: (b, qt, 0))

    attn_cost = pl.CostEstimate(
        flops=B * (4 * S_pad * S_pad * E + 2 * S_pad * E * E),
        transcendentals=B * H * S_pad * S_pad,
        bytes_accessed=((2 + 2 * n_q) * B * S_pad * E) * x_isz
                       + (E * E + E) * w_isz,
    )

    out = pl.pallas_call(
        functools.partial(_flash_attn_kernel,
                          kv_len=S, kv_len_padded=S_pad, tk=TK),
        out_shape=jax.ShapeDtypeStruct((B, S_pad, E), dtype),
        grid_spec=pltpu.PrefetchScalarGridSpec(
            num_scalar_prefetch=0,
            grid=(B, n_q, n_kv),
            in_specs=[qh_spec, kv_spec, kv_spec, wo_spec, bo_spec],
            out_specs=o_spec,
            scratch_shapes=[
                pltpu.VMEM((H, TQ, 1), jnp.float32),    # running max
                pltpu.VMEM((H, TQ, 1), jnp.float32),    # running sum
                pltpu.VMEM((H, TQ, Dh), jnp.float32),   # un-normalized context
            ],
        ),
        compiler_params=pltpu.CompilerParams(
            dimension_semantics=("parallel", "parallel", "arbitrary"),
            vmem_limit_bytes=vmem_limit,
        ),
        cost_estimate=attn_cost,
    )(qh, kh, vh, wo_t, bo2)

    return out[:, :S, :] if pad else out


# ----------------------------------------------------------------------------
# Pure-JAX reference mirroring the PyTorch forward (eval mode, mask=None).
# ----------------------------------------------------------------------------
def _reference(query, key, value, params, *, num_heads):
    B, S, E = query.shape
    Dh = E // num_heads
    wq, bq, wk, bk, wv, bv, wo, bo = params
    with jax.default_matmul_precision("highest"):
        lin = lambda x, w, b: x @ w.T + b
        Q = lin(query, wq, bq).reshape(B, S, num_heads, Dh).transpose(0, 2, 1, 3)
        K = lin(key, wk, bk).reshape(B, S, num_heads, Dh).transpose(0, 2, 1, 3)
        V = lin(value, wv, bv).reshape(B, S, num_heads, Dh).transpose(0, 2, 1, 3)
        scores = jnp.einsum('bhqd,bhkd->bhqk', Q, K) / math.sqrt(Dh)
        attn = jax.nn.softmax(scores, axis=-1)
        out = jnp.einsum('bhqk,bhkd->bhqd', attn, V)
        out = out.transpose(0, 2, 1, 3).reshape(B, S, E)
        return lin(out, wo, bo)


if __name__ == "__main__":
    B, S, E, H = 2, 8, 32, 4

    key0 = jax.random.PRNGKey(0)
    keys = jax.random.split(key0, 11)

    # PyTorch nn.Linear-style parameters: W (out, in), b (out,).
    bound = 1.0 / math.sqrt(E)
    wq = jax.random.uniform(keys[0], (E, E), jnp.float32, -bound, bound)
    bq = jax.random.uniform(keys[1], (E,), jnp.float32, -bound, bound)
    wk = jax.random.uniform(keys[2], (E, E), jnp.float32, -bound, bound)
    bk = jax.random.uniform(keys[3], (E,), jnp.float32, -bound, bound)
    wv = jax.random.uniform(keys[4], (E, E), jnp.float32, -bound, bound)
    bv = jax.random.uniform(keys[5], (E,), jnp.float32, -bound, bound)
    wo = jax.random.uniform(keys[6], (E, E), jnp.float32, -bound, bound)
    bo = jax.random.uniform(keys[7], (E,), jnp.float32, -bound, bound)
    params = (wq, bq, wk, bk, wv, bv, wo, bo)

    query = jax.random.normal(keys[8], (B, S, E), jnp.float32)
    key_in = jax.random.normal(keys[9], (B, S, E), jnp.float32)
    value = jax.random.normal(keys[10], (B, S, E), jnp.float32)

    try:
        out = jax.block_until_ready(
            multi_head_attention(query, key_in, value, params, num_heads=H,
                                 single_buffer_weights=True))
    except Exception:
        # Fallback: if this JAX build rejects pipeline_mode=pl.Buffered(1),
        # run the identical kernel with default (double) buffering on weights.
        out = jax.block_until_ready(
            multi_head_attention(query, key_in, value, params, num_heads=H,
                                 single_buffer_weights=False))

    ref = _reference(query, key_in, value, params, num_heads=H)
    assert out.shape == (B, S, E)
    # Exact softmax normalization now -> tight tolerance (residual diff is just
    # MXU f32 matmul rounding / online-softmax reassociation).
    assert jnp.allclose(out, ref, atol=2e-3, rtol=2e-3), "mismatch vs reference"

    print("KERNEL_OK")
</pallas_src>

<mosaic_0001>
module attributes {stable_mosaic.version = 11 : i64} {
  func.func @_proj_kernel(%arg0: i32, %arg1: i32, %arg2: memref<1x8x32xf32, #tpu.memory_space<vmem>>, %arg3: memref<1x8x32xf32, #tpu.memory_space<vmem>>, %arg4: memref<1x8x32xf32, #tpu.memory_space<vmem>>, %arg5: memref<32x32xf32, #tpu.memory_space<vmem>>, %arg6: memref<1x32xf32, #tpu.memory_space<vmem>>, %arg7: memref<32x32xf32, #tpu.memory_space<vmem>>, %arg8: memref<1x32xf32, #tpu.memory_space<vmem>>, %arg9: memref<32x32xf32, #tpu.memory_space<vmem>>, %arg10: memref<1x32xf32, #tpu.memory_space<vmem>>, %arg11: memref<1x4x8x8xf32, #tpu.memory_space<vmem>>, %arg12: memref<1x4x8x8xf32, #tpu.memory_space<vmem>>, %arg13: memref<1x4x8x8xf32, #tpu.memory_space<vmem>>) attributes {dimension_semantics = [#tpu.dimension_semantics<parallel>, #tpu.dimension_semantics<parallel>], iteration_bounds = array<i64: 2, 1>, scalar_prefetch = 0 : i64, scratch_operands = 0 : i64, tpu.core_type = #tpu.core_type<tc>, window_params = [{transform_indices = @transform_0, window_bounds = array<i64: 1, 8, 32>}, {transform_indices = @transform_1, window_bounds = array<i64: 1, 8, 32>}, {transform_indices = @transform_2, window_bounds = array<i64: 1, 8, 32>}, {pipeline_mode = #tpu.pipeline_mode<synchronous>, transform_indices = @transform_3, window_bounds = array<i64: 32, 32>}, {pipeline_mode = #tpu.pipeline_mode<synchronous>, transform_indices = @transform_4, window_bounds = array<i64: 1, 32>}, {pipeline_mode = #tpu.pipeline_mode<synchronous>, transform_indices = @transform_5, window_bounds = array<i64: 32, 32>}, {pipeline_mode = #tpu.pipeline_mode<synchronous>, transform_indices = @transform_6, window_bounds = array<i64: 1, 32>}, {pipeline_mode = #tpu.pipeline_mode<synchronous>, transform_indices = @transform_7, window_bounds = array<i64: 32, 32>}, {pipeline_mode = #tpu.pipeline_mode<synchronous>, transform_indices = @transform_8, window_bounds = array<i64: 1, 32>}, {transform_indices = @transform_9, window_bounds = array<i64: 1, 4, 8, 8>}, {transform_indices = @transform_10, window_bounds = array<i64: 1, 4, 8, 8>}, {transform_indices = @transform_11, window_bounds = array<i64: 1, 4, 8, 8>}]} {
    %c0 = arith.constant 0 : index
    %c0_0 = arith.constant 0 : index
    %c0_1 = arith.constant 0 : index
    %0 = vector.load %arg2[%c0, %c0_0, %c0_1] : memref<1x8x32xf32, #tpu.memory_space<vmem>>, vector<1x8x32xf32>
    %1 = vector.shape_cast %0 : vector<1x8x32xf32> to vector<8x32xf32>
    %c0_2 = arith.constant 0 : index
    %c0_3 = arith.constant 0 : index
    %2 = vector.load %arg5[%c0_2, %c0_3] : memref<32x32xf32, #tpu.memory_space<vmem>>, vector<32x32xf32>
    %cst = arith.constant dense<0.000000e+00> : vector<8x32xf32>
    %3 = tpu.matmul %1, %2, %cst {dimension_numbers = #tpu.dot_dimension_numbers<[1], [0], [0], [1], [0, 0, 1, 1], [], []>} : vector<8x32xf32>, vector<32x32xf32>, vector<8x32xf32> -> vector<8x32xf32>
    %c0_4 = arith.constant 0 : index
    %c0_5 = arith.constant 0 : index
    %4 = vector.load %arg6[%c0_4, %c0_5] : memref<1x32xf32, #tpu.memory_space<vmem>>, vector<1x32xf32>
    %5 = vector.broadcast %4 : vector<1x32xf32> to vector<8x32xf32>
    %6 = arith.addf %3, %5 : vector<8x32xf32>
    %7 = vector.shape_cast %6 : vector<8x32xf32> to vector<8x4x8xf32>
    %8 = tpu.transpose %7, [1, 0, 2] : vector<8x4x8xf32> -> vector<4x8x8xf32>
    %c0_6 = arith.constant 0 : index
    %c0_7 = arith.constant 0 : index
    %c0_8 = arith.constant 0 : index
    %c0_9 = arith.constant 0 : index
    %9 = vector.load %arg11[%c0_6, %c0_7, %c0_8, %c0_9] : memref<1x4x8x8xf32, #tpu.memory_space<vmem>>, vector<1x4x8x8xf32>
    %10 = vector.shape_cast %9 : vector<1x4x8x8xf32> to vector<4x8x8xf32>
    %11 = vector.shape_cast %8 : vector<4x8x8xf32> to vector<1x4x8x8xf32>
    tpu.vector_store %arg11[%c0_6, %c0_7, %c0_8, %c0_9], %11 {strides = array<i32>} : memref<1x4x8x8xf32, #tpu.memory_space<vmem>>, vector<1x4x8x8xf32>,
    %c0_10 = arith.constant 0 : index
    %c0_11 = arith.constant 0 : index
    %c0_12 = arith.constant 0 : index
    %12 = vector.load %arg3[%c0_10, %c0_11, %c0_12] : memref<1x8x32xf32, #tpu.memory_space<vmem>>, vector<1x8x32xf32>
    %13 = vector.shape_cast %12 : vector<1x8x32xf32> to vector<8x32xf32>
    %c0_13 = arith.constant 0 : index
    %c0_14 = arith.constant 0 : index
    %14 = vector.load %arg7[%c0_13, %c0_14] : memref<32x32xf32, #tpu.memory_space<vmem>>, vector<32x32xf32>
    %cst_15 = arith.constant dense<0.000000e+00> : vector<8x32xf32>
    %15 = tpu.matmul %13, %14, %cst_15 {dimension_numbers = #tpu.dot_dimension_numbers<[1], [0], [0], [1], [0, 0, 1, 1], [], []>} : vector<8x32xf32>, vector<32x32xf32>, vector<8x32xf32> -> vector<8x32xf32>
    %c0_16 = arith.constant 0 : index
    %c0_17 = arith.constant 0 : index
    %16 = vector.load %arg8[%c0_16, %c0_17] : memref<1x32xf32, #tpu.memory_space<vmem>>, vector<1x32xf32>
    %17 = vector.broadcast %16 : vector<1x32xf32> to vector<8x32xf32>
    %18 = arith.addf %15, %17 : vector<8x32xf32>
    %19 = vector.shape_cast %18 : vector<8x32xf32> to vector<8x4x8xf32>
    %20 = tpu.transpose %19, [1, 0, 2] : vector<8x4x8xf32> -> vector<4x8x8xf32>
    %c0_18 = arith.constant 0 : index
    %c0_19 = arith.constant 0 : index
    %c0_20 = arith.constant 0 : index
    %c0_21 = arith.constant 0 : index
    %21 = vector.load %arg12[%c0_18, %c0_19, %c0_20, %c0_21] : memref<1x4x8x8xf32, #tpu.memory_space<vmem>>, vector<1x4x8x8xf32>
    %22 = vector.shape_cast %21 : vector<1x4x8x8xf32> to vector<4x8x8xf32>
    %23 = vector.shape_cast %20 : vector<4x8x8xf32> to vector<1x4x8x8xf32>
    tpu.vector_store %arg12[%c0_18, %c0_19, %c0_20, %c0_21], %23 {strides = array<i32>} : memref<1x4x8x8xf32, #tpu.memory_space<vmem>>, vector<1x4x8x8xf32>,
    %c0_22 = arith.constant 0 : index
    %c0_23 = arith.constant 0 : index
    %c0_24 = arith.constant 0 : index
    %24 = vector.load %arg4[%c0_22, %c0_23, %c0_24] : memref<1x8x32xf32, #tpu.memory_space<vmem>>, vector<1x8x32xf32>
    %25 = vector.shape_cast %24 : vector<1x8x32xf32> to vector<8x32xf32>
    %c0_25 = arith.constant 0 : index
    %c0_26 = arith.constant 0 : index
    %26 = vector.load %arg9[%c0_25, %c0_26] : memref<32x32xf32, #tpu.memory_space<vmem>>, vector<32x32xf32>
    %cst_27 = arith.constant dense<0.000000e+00> : vector<8x32xf32>
    %27 = tpu.matmul %25, %26, %cst_27 {dimension_numbers = #tpu.dot_dimension_numbers<[1], [0], [0], [1], [0, 0, 1, 1], [], []>} : vector<8x32xf32>, vector<32x32xf32>, vector<8x32xf32> -> vector<8x32xf32>
    %c0_28 = arith.constant 0 : index
    %c0_29 = arith.constant 0 : index
    %28 = vector.load %arg10[%c0_28, %c0_29] : memref<1x32xf32, #tpu.memory_space<vmem>>, vector<1x32xf32>
    %29 = vector.broadcast %28 : vector<1x32xf32> to vector<8x32xf32>
    %30 = arith.addf %27, %29 : vector<8x32xf32>
    %31 = vector.shape_cast %30 : vector<8x32xf32> to vector<8x4x8xf32>
    %32 = tpu.transpose %31, [1, 0, 2] : vector<8x4x8xf32> -> vector<4x8x8xf32>
    %c0_30 = arith.constant 0 : index
    %c0_31 = arith.constant 0 : index
    %c0_32 = arith.constant 0 : index
    %c0_33 = arith.constant 0 : index
    %33 = vector.load %arg13[%c0_30, %c0_31, %c0_32, %c0_33] : memref<1x4x8x8xf32, #tpu.memory_space<vmem>>, vector<1x4x8x8xf32>
    %34 = vector.shape_cast %33 : vector<1x4x8x8xf32> to vector<4x8x8xf32>
    %35 = vector.shape_cast %32 : vector<4x8x8xf32> to vector<1x4x8x8xf32>
    tpu.vector_store %arg13[%c0_30, %c0_31, %c0_32, %c0_33], %35 {strides = array<i32>} : memref<1x4x8x8xf32, #tpu.memory_space<vmem>>, vector<1x4x8x8xf32>,
    return
  }
  func.func @transform_0(%arg0: i32, %arg1: i32) -> (i32, i32, i32) {
    %c0_i32 = arith.constant 0 : i32
    %c0_i32_0 = arith.constant 0 : i32
    return %arg0, %arg1, %c0_i32 : i32, i32, i32
  }
  func.func @transform_1(%arg0: i32, %arg1: i32) -> (i32, i32, i32) {
    %c0_i32 = arith.constant 0 : i32
    %c0_i32_0 = arith.constant 0 : i32
    return %arg0, %arg1, %c0_i32 : i32, i32, i32
  }
  func.func @transform_2(%arg0: i32, %arg1: i32) -> (i32, i32, i32) {
    %c0_i32 = arith.constant 0 : i32
    %c0_i32_0 = arith.constant 0 : i32
    return %arg0, %arg1, %c0_i32 : i32, i32, i32
  }
  func.func @transform_3(%arg0: i32, %arg1: i32) -> (i32, i32) {
    %c0_i32 = arith.constant 0 : i32
    %c0_i32_0 = arith.constant 0 : i32
    %c0_i32_1 = arith.constant 0 : i32
    return %c0_i32, %c0_i32_0 : i32, i32
  }
  func.func @transform_4(%arg0: i32, %arg1: i32) -> (i32, i32) {
    %c0_i32 = arith.constant 0 : i32
    %c0_i32_0 = arith.constant 0 : i32
    %c0_i32_1 = arith.constant 0 : i32
    return %c0_i32, %c0_i32_0 : i32, i32
  }
  func.func @transform_5(%arg0: i32, %arg1: i32) -> (i32, i32) {
    %c0_i32 = arith.constant 0 : i32
    %c0_i32_0 = arith.constant 0 : i32
    %c0_i32_1 = arith.constant 0 : i32
    return %c0_i32, %c0_i32_0 : i32, i32
  }
  func.func @transform_6(%arg0: i32, %arg1: i32) -> (i32, i32) {
    %c0_i32 = arith.constant 0 : i32
    %c0_i32_0 = arith.constant 0 : i32
    %c0_i32_1 = arith.constant 0 : i32
    return %c0_i32, %c0_i32_0 : i32, i32
  }
  func.func @transform_7(%arg0: i32, %arg1: i32) -> (i32, i32) {
    %c0_i32 = arith.constant 0 : i32
    %c0_i32_0 = arith.constant 0 : i32
    %c0_i32_1 = arith.constant 0 : i32
    return %c0_i32, %c0_i32_0 : i32, i32
  }
  func.func @transform_8(%arg0: i32, %arg1: i32) -> (i32, i32) {
    %c0_i32 = arith.constant 0 : i32
    %c0_i32_0 = arith.constant 0 : i32
    %c0_i32_1 = arith.constant 0 : i32
    return %c0_i32, %c0_i32_0 : i32, i32
  }
  func.func @transform_9(%arg0: i32, %arg1: i32) -> (i32, i32, i32, i32) {
    %c0_i32 = arith.constant 0 : i32
    %c0_i32_0 = arith.constant 0 : i32
    %c0_i32_1 = arith.constant 0 : i32
    return %arg0, %c0_i32, %arg1, %c0_i32_0 : i32, i32, i32, i32
  }
  func.func @transform_10(%arg0: i32, %arg1: i32) -> (i32, i32, i32, i32) {
    %c0_i32 = arith.constant 0 : i32
    %c0_i32_0 = arith.constant 0 : i32
    %c0_i32_1 = arith.constant 0 : i32
    return %arg0, %c0_i32, %arg1, %c0_i32_0 : i32, i32, i32, i32
  }
  func.func @transform_11(%arg0: i32, %arg1: i32) -> (i32, i32, i32, i32) {
    %c0_i32 = arith.constant 0 : i32
    %c0_i32_0 = arith.constant 0 : i32
    %c0_i32_1 = arith.constant 0 : i32
    return %arg0, %c0_i32, %arg1, %c0_i32_0 : i32, i32, i32, i32
  }
}

module attributes {stable_mosaic.version = 11 : i64} {
  func.func @_proj_kernel(%arg0: i32, %arg1: i32, %arg2: memref<1x8x32xf32, #tpu.memory_space<vmem>>, %arg3: memref<1x8x32xf32, #tpu.memory_space<vmem>>, %arg4: memref<1x8x32xf32, #tpu.memory_space<vmem>>, %arg5: memref<32x32xf32, #tpu.memory_space<vmem>>, %arg6: memref<1x32xf32, #tpu.memory_space<vmem>>, %arg7: memref<32x32xf32, #tpu.memory_space<vmem>>, %arg8: memref<1x32xf32, #tpu.memory_space<vmem>>, %arg9: memref<32x32xf32, #tpu.memory_space<vmem>>, %arg10: memref<1x32xf32, #tpu.memory_space<vmem>>, %arg11: memref<1x4x8x8xf32, #tpu.memory_space<vmem>>, %arg12: memref<1x4x8x8xf32, #tpu.memory_space<vmem>>, %arg13: memref<1x4x8x8xf32, #tpu.memory_space<vmem>>) attributes {dimension_semantics = [#tpu.dimension_semantics<parallel>, #tpu.dimension_semantics<parallel>], iteration_bounds = array<i64: 2, 1>, scalar_prefetch = 0 : i64, scratch_operands = 0 : i64, tpu.core_type = #tpu.core_type<tc>, window_params = [{transform_indices = @transform_0, window_bounds = array<i64: 1, 8, 32>}, {transform_indices = @transform_1, window_bounds = array<i64: 1, 8, 32>}, {transform_indices = @transform_2, window_bounds = array<i64: 1, 8, 32>}, {pipeline_mode = #tpu.pipeline_mode<synchronous>, transform_indices = @transform_3, window_bounds = array<i64: 32, 32>}, {pipeline_mode = #tpu.pipeline_mode<synchronous>, transform_indices = @transform_4, window_bounds = array<i64: 1, 32>}, {pipeline_mode = #tpu.pipeline_mode<synchronous>, transform_indices = @transform_5, window_bounds = array<i64: 32, 32>}, {pipeline_mode = #tpu.pipeline_mode<synchronous>, transform_indices = @transform_6, window_bounds = array<i64: 1, 32>}, {pipeline_mode = #tpu.pipeline_mode<synchronous>, transform_indices = @transform_7, window_bounds = array<i64: 32, 32>}, {pipeline_mode = #tpu.pipeline_mode<synchronous>, transform_indices = @transform_8, window_bounds = array<i64: 1, 32>}, {transform_indices = @transform_9, window_bounds = array<i64: 1, 4, 8, 8>}, {transform_indices = @transform_10, window_bounds = array<i64: 1, 4, 8, 8>}, {transform_indices = @transform_11, window_bounds = array<i64: 1, 4, 8, 8>}]} {
    %c0 = arith.constant 0 : index
    %c0_0 = arith.constant 0 : index
    %c0_1 = arith.constant 0 : index
    %0 = vector.load %arg2[%c0, %c0_0, %c0_1] : memref<1x8x32xf32, #tpu.memory_space<vmem>>, vector<1x8x32xf32>
    %1 = vector.shape_cast %0 : vector<1x8x32xf32> to vector<8x32xf32>
    %c0_2 = arith.constant 0 : index
    %c0_3 = arith.constant 0 : index
    %2 = vector.load %arg5[%c0_2, %c0_3] : memref<32x32xf32, #tpu.memory_space<vmem>>, vector<32x32xf32>
    %cst = arith.constant dense<0.000000e+00> : vector<8x32xf32>
    %3 = tpu.matmul %1, %2, %cst {dimension_numbers = #tpu.dot_dimension_numbers<[1], [0], [0], [1], [0, 0, 1, 1], [], []>} : vector<8x32xf32>, vector<32x32xf32>, vector<8x32xf32> -> vector<8x32xf32>
    %c0_4 = arith.constant 0 : index
    %c0_5 = arith.constant 0 : index
    %4 = vector.load %arg6[%c0_4, %c0_5] : memref<1x32xf32, #tpu.memory_space<vmem>>, vector<1x32xf32>
    %5 = vector.broadcast %4 : vector<1x32xf32> to vector<8x32xf32>
    %6 = arith.addf %3, %5 : vector<8x32xf32>
    %7 = vector.shape_cast %6 : vector<8x32xf32> to vector<8x4x8xf32>
    %8 = tpu.transpose %7, [1, 0, 2] : vector<8x4x8xf32> -> vector<4x8x8xf32>
    %c0_6 = arith.constant 0 : index
    %c0_7 = arith.constant 0 : index
    %c0_8 = arith.constant 0 : index
    %c0_9 = arith.constant 0 : index
    %9 = vector.load %arg11[%c0_6, %c0_7, %c0_8, %c0_9] : memref<1x4x8x8xf32, #tpu.memory_space<vmem>>, vector<1x4x8x8xf32>
    %10 = vector.shape_cast %9 : vector<1x4x8x8xf32> to vector<4x8x8xf32>
    %11 = vector.shape_cast %8 : vector<4x8x8xf32> to vector<1x4x8x8xf32>
    tpu.vector_store %arg11[%c0_6, %c0_7, %c0_8, %c0_9], %11 {strides = array<i32>} : memref<1x4x8x8xf32, #tpu.memory_space<vmem>>, vector<1x4x8x8xf32>,
    %c0_10 = arith.constant 0 : index
    %c0_11 = arith.constant 0 : index
    %c0_12 = arith.constant 0 : index
    %12 = vector.load %arg3[%c0_10, %c0_11, %c0_12] : memref<1x8x32xf32, #tpu.memory_space<vmem>>, vector<1x8x32xf32>
    %13 = vector.shape_cast %12 : vector<1x8x32xf32> to vector<8x32xf32>
    %c0_13 = arith.constant 0 : index
    %c0_14 = arith.constant 0 : index
    %14 = vector.load %arg7[%c0_13, %c0_14] : memref<32x32xf32, #tpu.memory_space<vmem>>, vector<32x32xf32>
    %cst_15 = arith.constant dense<0.000000e+00> : vector<8x32xf32>
    %15 = tpu.matmul %13, %14, %cst_15 {dimension_numbers = #tpu.dot_dimension_numbers<[1], [0], [0], [1], [0, 0, 1, 1], [], []>} : vector<8x32xf32>, vector<32x32xf32>, vector<8x32xf32> -> vector<8x32xf32>
    %c0_16 = arith.constant 0 : index
    %c0_17 = arith.constant 0 : index
    %16 = vector.load %arg8[%c0_16, %c0_17] : memref<1x32xf32, #tpu.memory_space<vmem>>, vector<1x32xf32>
    %17 = vector.broadcast %16 : vector<1x32xf32> to vector<8x32xf32>
    %18 = arith.addf %15, %17 : vector<8x32xf32>
    %19 = vector.shape_cast %18 : vector<8x32xf32> to vector<8x4x8xf32>
    %20 = tpu.transpose %19, [1, 0, 2] : vector<8x4x8xf32> -> vector<4x8x8xf32>
    %c0_18 = arith.constant 0 : index
    %c0_19 = arith.constant 0 : index
    %c0_20 = arith.constant 0 : index
    %c0_21 = arith.constant 0 : index
    %21 = vector.load %arg12[%c0_18, %c0_19, %c0_20, %c0_21] : memref<1x4x8x8xf32, #tpu.memory_space<vmem>>, vector<1x4x8x8xf32>
    %22 = vector.shape_cast %21 : vector<1x4x8x8xf32> to vector<4x8x8xf32>
    %23 = vector.shape_cast %20 : vector<4x8x8xf32> to vector<1x4x8x8xf32>
    tpu.vector_store %arg12[%c0_18, %c0_19, %c0_20, %c0_21], %23 {strides = array<i32>} : memref<1x4x8x8xf32, #tpu.memory_space<vmem>>, vector<1x4x8x8xf32>,
    %c0_22 = arith.constant 0 : index
    %c0_23 = arith.constant 0 : index
    %c0_24 = arith.constant 0 : index
    %24 = vector.load %arg4[%c0_22, %c0_23, %c0_24] : memref<1x8x32xf32, #tpu.memory_space<vmem>>, vector<1x8x32xf32>
    %25 = vector.shape_cast %24 : vector<1x8x32xf32> to vector<8x32xf32>
    %c0_25 = arith.constant 0 : index
    %c0_26 = arith.constant 0 : index
    %26 = vector.load %arg9[%c0_25, %c0_26] : memref<32x32xf32, #tpu.memory_space<vmem>>, vector<32x32xf32>
    %cst_27 = arith.constant dense<0.000000e+00> : vector<8x32xf32>
    %27 = tpu.matmul %25, %26, %cst_27 {dimension_numbers = #tpu.dot_dimension_numbers<[1], [0], [0], [1], [0, 0, 1, 1], [], []>} : vector<8x32xf32>, vector<32x32xf32>, vector<8x32xf32> -> vector<8x32xf32>
    %c0_28 = arith.constant 0 : index
    %c0_29 = arith.constant 0 : index
    %28 = vector.load %arg10[%c0_28, %c0_29] : memref<1x32xf32, #tpu.memory_space<vmem>>, vector<1x32xf32>
    %29 = vector.broadcast %28 : vector<1x32xf32> to vector<8x32xf32>
    %30 = arith.addf %27, %29 : vector<8x32xf32>
    %31 = vector.shape_cast %30 : vector<8x32xf32> to vector<8x4x8xf32>
    %32 = tpu.transpose %31, [1, 0, 2] : vector<8x4x8xf32> -> vector<4x8x8xf32>
    %c0_30 = arith.constant 0 : index
    %c0_31 = arith.constant 0 : index
    %c0_32 = arith.constant 0 : index
    %c0_33 = arith.constant 0 : index
    %33 = vector.load %arg13[%c0_30, %c0_31, %c0_32, %c0_33] : memref<1x4x8x8xf32, #tpu.memory_space<vmem>>, vector<1x4x8x8xf32>
    %34 = vector.shape_cast %33 : vector<1x4x8x8xf32> to vector<4x8x8xf32>
    %35 = vector.shape_cast %32 : vector<4x8x8xf32> to vector<1x4x8x8xf32>
    tpu.vector_store %arg13[%c0_30, %c0_31, %c0_32, %c0_33], %35 {strides = array<i32>} : memref<1x4x8x8xf32, #tpu.memory_space<vmem>>, vector<1x4x8x8xf32>,
    return
  }
  func.func @transform_0(%arg0: i32, %arg1: i32) -> (i32, i32, i32) {
    %c0_i32 = arith.constant 0 : i32
    %c0_i32_0 = arith.constant 0 : i32
    return %arg0, %arg1, %c0_i32 : i32, i32, i32
  }
  func.func @transform_1(%arg0: i32, %arg1: i32) -> (i32, i32, i32) {
    %c0_i32 = arith.constant 0 : i32
    %c0_i32_0 = arith.constant 0 : i32
    return %arg0, %arg1, %c0_i32 : i32, i32, i32
  }
  func.func @transform_2(%arg0: i32, %arg1: i32) -> (i32, i32, i32) {
    %c0_i32 = arith.constant 0 : i32
    %c0_i32_0 = arith.constant 0 : i32
    return %arg0, %arg1, %c0_i32 : i32, i32, i32
  }
  func.func @transform_3(%arg0: i32, %arg1: i32) -> (i32, i32) {
    %c0_i32 = arith.constant 0 : i32
    %c0_i32_0 = arith.constant 0 : i32
    %c0_i32_1 = arith.constant 0 : i32
    return %c0_i32, %c0_i32_0 : i32, i32
  }
  func.func @transform_4(%arg0: i32, %arg1: i32) -> (i32, i32) {
    %c0_i32 = arith.constant 0 : i32
    %c0_i32_0 = arith.constant 0 : i32
    %c0_i32_1 = arith.constant 0 : i32
    return %c0_i32, %c0_i32_0 : i32, i32
  }
  func.func @transform_5(%arg0: i32, %arg1: i32) -> (i32, i32) {
    %c0_i32 = arith.constant 0 : i32
    %c0_i32_0 = arith.constant 0 : i32
    %c0_i32_1 = arith.constant 0 : i32
    return %c0_i32, %c0_i32_0 : i32, i32
  }
  func.func @transform_6(%arg0: i32, %arg1: i32) -> (i32, i32) {
    %c0_i32 = arith.constant 0 : i32
    %c0_i32_0 = arith.constant 0 : i32
    %c0_i32_1 = arith.constant 0 : i32
    return %c0_i32, %c0_i32_0 : i32, i32
  }
  func.func @transform_7(%arg0: i32, %arg1: i32) -> (i32, i32) {
    %c0_i32 = arith.constant 0 : i32
    %c0_i32_0 = arith.constant 0 : i32
    %c0_i32_1 = arith.constant 0 : i32
    return %c0_i32, %c0_i32_0 : i32, i32
  }
  func.func @transform_8(%arg0: i32, %arg1: i32) -> (i32, i32) {
    %c0_i32 = arith.constant 0 : i32
    %c0_i32_0 = arith.constant 0 : i32
    %c0_i32_1 = arith.constant 0 : i32
    return %c0_i32, %c0_i32_0 : i32, i32
  }
  func.func @transform_9(%arg0: i32, %arg1: i32) -> (i32, i32, i32, i32) {
    %c0_i32 = arith.constant 0 : i32
    %c0_i32_0 = arith.constant 0 : i32
    %c0_i32_1 = arith.constant 0 : i32
    return %arg0, %c0_i32, %arg1, %c0_i32_0 : i32, i32, i32, i32
  }
  func.func @transform_10(%arg0: i32, %arg1: i32) -> (i32, i32, i32, i32) {
    %c0_i32 = arith.constant 0 : i32
    %c0_i32_0 = arith.constant 0 : i32
    %c0_i32_1 = arith.constant 0 : i32
    return %arg0, %c0_i32, %arg1, %c0_i32_0 : i32, i32, i32, i32
  }
  func.func @transform_11(%arg0: i32, %arg1: i32) -> (i32, i32, i32, i32) {
    %c0_i32 = arith.constant 0 : i32
    %c0_i32_0 = arith.constant 0 : i32
    %c0_i32_1 = arith.constant 0 : i32
    return %arg0, %c0_i32, %arg1, %c0_i32_0 : i32, i32, i32, i32
  }
}

</mosaic_0001>

<bundles_post_ra>
// kernel: tpu_custom_call.1
= control target key start
LH: loop header
LB: loop body
LE: loop exit
PB: predicated region body
PF: predicated region fallthrough
CT: control target
= control target key end

     0   :  { %s2736_s0 = inlined_call_operand.hbm [shape: f32[2,8,32], index: 0, kind: input, shape index: {}]   ;;  %s2737_s1 = inlined_call_operand.hbm [shape: f32[2,8,32], index: 1, kind: input, shape index: {}]   ;;  %s2738_s2 = inlined_call_operand.hbm [shape: f32[2,8,32], index: 2, kind: input, shape index: {}]   ;;  %s2739_s3 = inlined_call_operand.hbm [shape: f32[32,32], index: 3, kind: input, shape index: {}]   ;;  %s2740_s4 = inlined_call_operand.vmem [shape: f32[1,32], index: 4, kind: input, shape index: {}]   ;;  %s2741_s5 = inlined_call_operand.hbm [shape: f32[32,32], index: 5, kind: input, shape index: {}]   ;;  %s2742_s6 = inlined_call_operand.vmem [shape: f32[1,32], index: 6, kind: input, shape index: {}]   ;;  %s2743_s7 = inlined_call_operand.hbm [shape: f32[32,32], index: 7, kind: input, shape index: {}]   ;;  %s2744_s8 = inlined_call_operand.vmem [shape: f32[1,32], index: 8, kind: input, shape index: {}]   ;;  %s2745_s9 = inlined_call_operand.hbm [shape: f32[2,4,8,8], index: 9, kind: output, shape index: {0}]   ;;  %s2746_s10 = inlined_call_operand.hbm [shape: f32[2,4,8,8], index: 10, kind: output, shape index: {1}]   ;;  %s2747_s11 = inlined_call_operand.hbm [shape: f32[2,4,8,8], index: 11, kind: output, shape index: {2}]  }
   0x1   :  { %2777 = sst [smem:[#allocation31_spill]] %s2737_s1 }
   0x2   :  { %2778 = sst [smem:[#allocation32_spill]] %s2739_s3 }
   0x3   :  { %2779 = sst [smem:[#allocation33_spill]] %s2740_s4 }
   0x4   :  { %2780 = sst [smem:[#allocation34_spill]] %s2744_s8 }
   0x5   :  { %2781 = sst [smem:[#allocation35_spill]] %s2745_s9 }
   0x6   :  { %2782 = sst [smem:[#allocation36_spill]] %s2746_s10 }
   0x7   :  { %2783 = sst [smem:[#allocation37_spill]] %s2747_s11 }
   0x8   :  { %17 = vsyncpa [#allocation3], 0 }
   0x9   :  { %19 = vsyncpa [#allocation3 + $0x1], 0 }
   0xa   :  { %20 = vsyncpa [#allocation6], 0 }
   0xb   :  { %22 = vsyncpa [#allocation6 + $0x1], 0 }
   0xc   :  { %23 = vsyncpa [#allocation9], 0 }
   0xd   :  { %24 = vsyncpa [#allocation12], 0 }
   0xe   :  { %25 = vsyncpa [#allocation4], 0 }
   0xf   :  { %27 = vsyncpa [#allocation4 + $0x1], 0 }
  0x10   :  { %28 = vsyncpa [#allocation15], 0 }
  0x11   :  { %30 = vsyncpa [#allocation15 + $0x1], 0  ;;  %s2202_s17 = smov 0   ;;  %s2204_s18 = smov 0  }
  0x12   :  { %s2206_s19 = smov 0   ;;  %s2208_s20 = smov 0  }
  0x13   :  { %s2210_s21 = smov 0   ;;  %s2212_s22 = smov 0  }
  0x14 LB: > { %2784 = sst [smem:[#allocation23_spill]] %s2099_s17  ;;  %s2233_s23 = sadd.s32 4294967295, %s2119_s22   ;;  %s2119_s22 = sphi %s2212_s22, %s36_s22   ;;  %s2115_s21 = sphi %s2210_s21, %s2834_s21   ;;  %s2111_s20 = sphi %s2208_s20, %s2833_s20   ;;  %s2107_s19 = sphi %s2206_s19, %s2837_s19   ;;  %s2103_s18 = sphi %s2204_s18, %s2836_s18   ;;  %s2099_s17 = sphi %s2202_s17, %s2835_s17  }
  0x15   : > { %2785 = sst [smem:[#allocation24_spill]] %s2111_s20  ;;  %s2748_s24 = sadd.s32 4294967294, %s2119_s22  }
  0x16   : > { %2786 = sst [smem:[#allocation25_spill]] %s2115_s21  ;;  %p70_p0 = scmp.ne.s32.totalorder %s2103_s18, %s2099_s17 }
  0x17   : > { %2787 = sst [smem:[#allocation26_spill]] %s2119_s22  ;;  %p2751_p1 = scmp.eq.s32.totalorder %s2233_s23, 0 }
  0x18   : > { %p284_p3 = scmp.eq.s32.totalorder %s2748_s24, 1  ;;  %p1553_p5 = scmp.ge.s32.totalorder %s2119_s22, 1 }
  0x19   : > { %p2244_p4 = por %p2751_p1, %p70_p0  ;;  %p347_p7 = scmp.lt.s32.totalorder %s2119_s22, 3 }
  0x1a   : > { %p2249_p6 = por %p284_p3, %p70_p0  ;;  %s2121_s28 = smov [#allocation8]  }
  0x1b   : > { %s2788_s25 = scalar_select %p2244_p4, 1, 0 }
  0x1c   : > { %s2789_s26 = scalar_select %p2249_p6, 1, 0 }
  0x1d   : > { %p2254_p8 = pnand %p1553_p5, %p347_p7  ;;  %s359_s29 = sshll.u32 %s2121_s28, 4  ;;  %s360_s29 = int_to_ptr.vmem [resolvable:$true] %s359_s29 }
  0x1e   : > { %2790 = sst [smem:[#allocation27_spill]] %s2789_s26  ;;  %s48_s12 = sadd.s32 1, %s2115_s21 }
  0x1f   : > { %s2791_s27 = scalar_select %p2254_p8, 1, 0 }
  0x20   : > { %p1690_p9 = pneg %p2254_p8  ;;  %s2793_s3 = sld [smem:[#allocation32_spill]] }
  0x22   : > { %p2263_p11 = pnand %p1690_p9, %p2751_p1 }
  0x24   : > { %s2792_s30 = scalar_select %p2263_p11, 1, 0 }
  0x25   : > { %p2276_p13 = pneg %p2263_p11 }
  0x26   : > { %s1791_s15 = scalar_lea.hbm %s2793_s3, 512 }
  0x27   : > { %p1792_p12 = scmp.ne.s32.totalorder %s2793_s3, %s1791_s15  ;;  %p1798_p5 = scmp.lt.u32.totalorder %s1791_s15, %s2793_s3 }
  0x28   : > { %s2794_s28 = scalar_select %p2276_p13, 1, 0 }
  0x29   : > { %p1794_p0 = pnand %p2276_p13, %p1792_p12 }
  0x2b   : > { %p1795_p3 = pneg %p1794_p0 }
  0x2d   : > { %p1800_p7 = pnand %p1798_p5, %p1795_p3 }
  0x2f   : > { %1803 = shalt.err (!%p1800_p7)
}
  0x30   : > { %s1804_s13 = scalar_lea.vmem %s360_s29, 512  ;;  %p1812_p2 = scmp.lt.s32.totalorder %s360_s29, %s360_s29 }
  0x31   : > { %p1805_p9 = scmp.ne.s32.totalorder %s360_s29, %s1804_s13  ;;  %p1813_p6 = scmp.lt.s32.totalorder %s1804_s13, %s1804_s13 }
  0x33   : > { %p1807_p10 = pnand %p1805_p9, %p2276_p13  ;;  %p1814_p4 = por %p1813_p6, %p1812_p2 }
  0x35   : > { %p1808_p1 = pneg %p1807_p10 }
  0x37   : > { %p1815_p8 = pnand %p1814_p4, %p1808_p1 }
  0x39   : > { %1818 = shalt.err (!%p1815_p8)
}
  0x3a   : > { %s2755_s24 = smov 128   ;;  %s2757_s17 = smov 8  }
  0x3b   : > { %1693 = dma.hbm_to_vmem [thread:$0]  (!%p2263_p11), %s2793_s3, 512, %s360_s29, [#allocation9], %s2755_s24, %s2755_s24, %s2757_s17  }
  0x3c   : > { %p50_p1 = scmp.ge.s32.totalorder %s48_s12, 2  ;;  %s57_s15 = sadd.s32 1, %s2107_s19 }
  0x3d   : > { %p64_p2 = scmp.ne.s32.totalorder %s2107_s19, %s2103_s18  ;;  %p65_p4 = scmp.eq.s32.totalorder %s2119_s22, 0 }
  0x3e   : > { %s2839_s12 = smov (%p50_p1, %s48_s12), 0  ;;  %p2796_p8 = scmp.eq.s32.totalorder %s2233_s23, 1 }
  0x3f   : > { %2795 = sst [smem:[#allocation28_spill]] %s2839_s12  ;;  %p66_p6 = por %p65_p4, %p64_p2 }
  0x40   : > { %p2303_p10 = por %p2796_p8, %p64_p2  ;;  %s52_s13 = ssub.s32 %s2115_s21, %s2839_s12 }
  0x41   : > { %p1723_p12 = scmp.lt.s32.totalorder %s2119_s22, 2  ;;  %p55_p0 = scmp.eq.s32.totalorder %s52_s13, 0 }
  0x42   : > { %s2797_s16 = scalar_select %p2303_p10, 1, 0 }
  0x43   : > { %s2760_s11 = sand.u32 1, %s2107_s19   ;;  %s2316_s26 = sshll.u32 %s2115_s21, 7 }
  0x44   : > { %2798 = sst [smem:[#allocation29_spill]] %s2797_s16  ;;  %s2313_s29 = sshll.u32 %s2760_s11, 3 }
  0x45   : > { %s2319_s14 = scalar_select %p55_p0, %s2107_s19, %s57_s15  }
  0x46   : > { %p2321_p3 = pnand %p1723_p12, %p66_p6  ;;  %s427_s17 = sand.u32 1, %s2119_s22  }
  0x47   : > { %2799 = sst [smem:[#allocation30_spill]] %s2319_s14  ;;  %s2801_s1 = sld [smem:[#allocation31_spill]] }
  0x48   : > { %s2800_s24 = scalar_select %p2321_p3, 1, 0 }
  0x49   : > { %s431_s11 = scalar_lea.vmem [#allocation5], %s2313_s29  ;;  %s2124_s15 = smov [#allocation10]  }
  0x4a   : > { %s439_s21 = sshll.u32 %s431_s11, 4  ;;  %s2335_s14 = sshll.u32 %s2124_s15, 4  ;;  %s2333_s21 = int_to_ptr.vmem [resolvable:$true] %s439_s21  ;;  %s376_s14 = int_to_ptr.vmem [resolvable:$true] %s2335_s14 }
  0x4b   : > { %s2337_s9 = scalar_lea.sflag [#allocation6], %s427_s17  ;;  %p2343_p7 = pneg %p2321_p3 }
  0x4d   : > { %s2330_s13 = scalar_lea.hbm %s2801_s1, %s2316_s26  ;;  %s1824_s22 = scalar_lea.hbm %s2801_s1, 256 }
  0x4e   : > { %s1819_s16 = scalar_lea.hbm %s2330_s13, 128  ;;  %p1825_p2 = scmp.lt.u32.totalorder %s2330_s13, %s2801_s1 }
  0x4f   : > { %p1820_p5 = scmp.ne.s32.totalorder %s2330_s13, %s1819_s16  ;;  %p1826_p4 = scmp.lt.u32.totalorder %s1824_s22, %s1819_s16 }
  0x50   : > { %s2802_s3 = scalar_select %p2343_p7, 1, 0 }
  0x51   : > { %p1822_p9 = pnand %p2343_p7, %p1820_p5  ;;  %p1827_p6 = por %p1826_p4, %p1825_p2 }
  0x52   : > { %p1828_p8 = scmp.lt.u32.totalorder %s1819_s16, %s2330_s13 }
  0x53   : > { %p1823_p1 = pneg %p1822_p9 }
  0x54   : > { %p1829_p12 = por %p1828_p8, %p1827_p6 }
  0x56   : > { %p1830_p0 = pnand %p1829_p12, %p1823_p1 }
  0x58   : > { %1833 = shalt.err (!%p1830_p0)
}
  0x59   : > { %s1834_s17 = scalar_lea.vmem %s2333_s21, 128  ;;  %s2125_s12 = smov [#allocation5]  }
  0x5a   : > { %p1835_p5 = scmp.ne.s32.totalorder %s2333_s21, %s1834_s17  ;;  %s1839_s11 = sshll.u32 %s2125_s12, 4  ;;  %s1840_s11 = int_to_ptr.vmem [resolvable:$false] %s1839_s11 }
  0x5b   : > { %s1841_s10 = scalar_lea.vmem %s1840_s11, 256  ;;  %p1842_p11 = scmp.lt.s32.totalorder %s2333_s21, %s1840_s11 }
  0x5c   : > { %p1837_p9 = pnand %p1835_p5, %p2343_p7  ;;  %p1843_p13 = scmp.lt.s32.totalorder %s1841_s10, %s1834_s17 }
  0x5e   : > { %p1838_p10 = pneg %p1837_p9  ;;  %p1844_p2 = por %p1843_p13, %p1842_p11 }
  0x60   : > { %p1845_p4 = pnand %p1844_p2, %p1838_p10 }
  0x62   : > { %1848 = shalt.err (!%p1845_p4)
}
  0x63   : > { %1706 = dma.hbm_to_vmem [thread:$0]  (!%p2321_p3), %s2330_s13, 128, %s2333_s21, %s2337_s9  }
  0x64   : > { %s1849_s15 = scalar_lea.hbm %s2741_s5, 512  ;;  %p2803_p11 = scmp.ne.s32.totalorder %s2794_s28, 0 }
  0x65   : > { %p1850_p1 = scmp.ne.s32.totalorder %s2741_s5, %s1849_s15  ;;  %p1856_p6 = scmp.lt.u32.totalorder %s1849_s15, %s2741_s5 }
  0x67   : > { %p1852_p13 = pnand %p1850_p1, %p2803_p11 }
  0x69   : > { %p1853_p10 = pneg %p1852_p13 }
  0x6b   : > { %p1858_p8 = pnand %p1856_p6, %p1853_p10 }
  0x6d   : > { %1861 = shalt.err (!%p1858_p8)
}
  0x6e   : > { %s1862_s10 = scalar_lea.vmem %s376_s14, 512  ;;  %p1870_p9 = scmp.lt.s32.totalorder %s376_s14, %s376_s14 }
  0x6f   : > { %p1863_p12 = scmp.ne.s32.totalorder %s376_s14, %s1862_s10  ;;  %p1871_p2 = scmp.lt.s32.totalorder %s1862_s10, %s1862_s10 }
  0x71   : > { %p1865_p0 = pnand %p1863_p12, %p2803_p11  ;;  %p1872_p4 = por %p1871_p2, %p1870_p9 }
  0x73   : > { %p1866_p5 = pneg %p1865_p0 }
  0x75   : > { %p1873_p3 = pnand %p1872_p4, %p1866_p5 }
  0x77   : > { %1876 = shalt.err (!%p1873_p3)
}
  0x78   : > { %p2804_p1 = scmp.ne.s32.totalorder %s2792_s30, 0  ;;  %s2805_s1 = smov 8  }
  0x79   : > { %s2806_s21 = smov 128   ;;  %s2126_s16 = smov [#allocation11]  }
  0x7a   : > { %1696 = dma.hbm_to_vmem [thread:$0]  (!%p2804_p1), %s2741_s5, 512, %s376_s14, [#allocation9], %s2806_s21, %s2806_s21, %s2805_s1  }
  0x7b   : > { %s391_s15 = sshll.u32 %s2126_s16, 4  ;;  %s1877_s11 = scalar_lea.hbm %s2743_s7, 512  ;;  %s392_s15 = int_to_ptr.vmem [resolvable:$true] %s391_s15 }
  0x7c   : > { %p1878_p3 = scmp.ne.s32.totalorder %s2743_s7, %s1877_s11  ;;  %p1884_p6 = scmp.lt.u32.totalorder %s1877_s11, %s2743_s7 }
  0x7e   : > { %p1880_p13 = pnand %p1878_p3, %p2803_p11 }
  0x80   : > { %p1881_p10 = pneg %p1880_p13 }
  0x82   : > { %p1886_p8 = pnand %p1884_p6, %p1881_p10 }
  0x84   : > { %1889 = shalt.err (!%p1886_p8)
}
  0x85   : > { %s1890_s14 = scalar_lea.vmem %s392_s15, 512  ;;  %p1898_p9 = scmp.lt.s32.totalorder %s392_s15, %s392_s15 }
  0x86   : > { %p1891_p12 = scmp.ne.s32.totalorder %s392_s15, %s1890_s14  ;;  %p1899_p2 = scmp.lt.s32.totalorder %s1890_s14, %s1890_s14 }
  0x88   : > { %p1893_p0 = pnand %p1891_p12, %p2803_p11  ;;  %p1900_p4 = por %p1899_p2, %p1898_p9 }
  0x8a   : > { %p1894_p5 = pneg %p1893_p0 }
  0x8c   : > { %p1901_p7 = pnand %p1900_p4, %p1894_p5 }
  0x8e   : > { %1904 = shalt.err (!%p1901_p7)
}
  0x8f   : > { %1699 = dma.hbm_to_vmem [thread:$0]  (!%p2804_p1), %s2743_s7, 512, %s392_s15, [#allocation12], %s2806_s21, %s2806_s21, %s2805_s1  }
  0x90   : > { %s2414_s13 = scalar_lea.hbm %s2736_s0, %s2316_s26  ;;  %s412_s30 = scalar_lea.vmem [#allocation2], %s2313_s29 }
  0x91   : > { %s420_s22 = sshll.u32 %s412_s30, 4  ;;  %s2807_s16 = sand.u32 1, %s2107_s19   ;;  %s421_s22 = int_to_ptr.vmem [resolvable:$true] %s420_s22 }
  0x92   : > { %s409_s12 = scalar_lea.sflag [#allocation3], %s2807_s16  ;;  %s1905_s17 = scalar_lea.hbm %s2414_s13, 128 }
  0x93   : > { %p1906_p7 = scmp.ne.s32.totalorder %s2414_s13, %s1905_s17  ;;  %p2808_p11 = scmp.ne.s32.totalorder %s2802_s3, 0 }
  0x94   : > { %s1910_s15 = scalar_lea.hbm %s2736_s0, 256  ;;  %p1911_p1 = scmp.lt.u32.totalorder %s2414_s13, %s2736_s0 }
  0x95   : > { %p1908_p3 = pnand %p1906_p7, %p2808_p11  ;;  %p1912_p10 = scmp.lt.u32.totalorder %s1910_s15, %s1905_s17 }
  0x96   : > { %p1914_p8 = scmp.lt.u32.totalorder %s1905_s17, %s2414_s13 }
  0x97   : > { %p1909_p13 = pneg %p1908_p3  ;;  %p1913_p6 = por %p1912_p10, %p1911_p1 }
  0x99   : > { %p1915_p12 = por %p1914_p8, %p1913_p6 }
  0x9b   : > { %p1916_p0 = pnand %p1915_p12, %p1909_p13 }
  0x9d   : > { %1919 = shalt.err (!%p1916_p0)
}
  0x9e   : > { %s1920_s14 = scalar_lea.vmem %s421_s22, 128  ;;  %s2127_s4 = smov [#allocation2]  }
  0x9f   : > { %p1921_p5 = scmp.ne.s32.totalorder %s421_s22, %s1920_s14  ;;  %s1925_s8 = sshll.u32 %s2127_s4, 4  ;;  %s1926_s8 = int_to_ptr.vmem [resolvable:$false] %s1925_s8 }
  0xa0   : > { %s1927_s20 = scalar_lea.vmem %s1926_s8, 256  ;;  %p1928_p4 = scmp.lt.s32.totalorder %s421_s22, %s1926_s8 }
  0xa1   : > { %p1923_p9 = pnand %p1921_p5, %p2808_p11  ;;  %p1929_p7 = scmp.lt.s32.totalorder %s1927_s20, %s1920_s14 }
  0xa3   : > { %p1924_p2 = pneg %p1923_p9  ;;  %p1930_p3 = por %p1929_p7, %p1928_p4 }
  0xa5   : > { %p1931_p1 = pnand %p1930_p3, %p1924_p2 }
  0xa7   : > { %1934 = shalt.err (!%p1931_p1)
}
  0xa8   : > { %p2809_p10 = scmp.ne.s32.totalorder %s2800_s24, 0  ;;  %s2440_s16 = scalar_lea.hbm %s2738_s2, %s2316_s26 }
  0xa9   : > { %s450_s17 = scalar_lea.vmem [#allocation7], %s2313_s29  ;;  %s1935_s21 = scalar_lea.hbm %s2440_s16, 128 }
  0xaa   : > { %1703 = dma.hbm_to_vmem [thread:$0]  (!%p2809_p10), %s2414_s13, 128, %s421_s22, %s409_s12  }
  0xab   : > { %s458_s1 = sshll.u32 %s450_s17, 4  ;;  %p1936_p13 = scmp.ne.s32.totalorder %s2440_s16, %s1935_s21  ;;  %s459_s1 = int_to_ptr.vmem [resolvable:$true] %s458_s1 }
  0xac   : > { %s1940_s13 = scalar_lea.hbm %s2738_s2, 256  ;;  %p1941_p12 = scmp.lt.u32.totalorder %s2440_s16, %s2738_s2 }
  0xad   : > { %p1938_p6 = pnand %p1936_p13, %p2808_p11  ;;  %p1942_p0 = scmp.lt.u32.totalorder %s1940_s13, %s1935_s21 }
  0xae   : > { %p1944_p9 = scmp.lt.u32.totalorder %s1935_s21, %s2440_s16 }
  0xaf   : > { %p1939_p8 = pneg %p1938_p6  ;;  %p1943_p5 = por %p1942_p0, %p1941_p12 }
  0xb1   : > { %p1945_p2 = por %p1944_p9, %p1943_p5 }
  0xb3   : > { %p1946_p4 = pnand %p1945_p2, %p1939_p8 }
  0xb5   : > { %1949 = shalt.err (!%p1946_p4)
}
  0xb6   : > { %s1950_s29 = scalar_lea.vmem %s459_s1, 128  ;;  %s2128_s26 = smov [#allocation7]  }
  0xb7   : > { %p1951_p7 = scmp.ne.s32.totalorder %s459_s1, %s1950_s29  ;;  %s1955_s10 = sshll.u32 %s2128_s26, 4  ;;  %s1956_s10 = int_to_ptr.vmem [resolvable:$false] %s1955_s10 }
  0xb8   : > { %s1957_s14 = scalar_lea.vmem %s1956_s10, 256  ;;  %p1958_p13 = scmp.lt.s32.totalorder %s459_s1, %s1956_s10 }
  0xb9   : > { %p1953_p3 = pnand %p1951_p7, %p2808_p11  ;;  %p1959_p6 = scmp.lt.s32.totalorder %s1957_s14, %s1950_s29 }
  0xbb   : > { %p1954_p1 = pneg %p1953_p3  ;;  %p1960_p10 = por %p1959_p6, %p1958_p13 }
  0xbd   : > { %p1961_p0 = pnand %p1960_p10, %p1954_p1 }
  0xbf   : > { %1964 = shalt.err (!%p1961_p0)
}
  0xc0   : > { %p2810_p12 = scmp.ne.s32.totalorder %s2800_s24, 0  ;;  %p2811_p8 = scmp.ne.s32.totalorder %s2791_s27, 0 }
  0xc1   : > { %s2464_s3 = sand.u32 (!%p2811_p8), 1, %s2103_s18   ;;  %p2812_p11 = scmp.ne.s32.totalorder (!%p2811_p8), %s2788_s25, 0 }
  0xc2   : > { %1709 = dma.hbm_to_vmem [thread:$0]  (!%p2810_p12), %s2440_s16, 128, %s459_s1, %s2337_s9  }
  0xc3   : > { %467 = sbr.rel (%p2811_p8) target bundleno = 644 (0x284), region = 56  ;;  %s2467_s4 = sshll.u32 (!%p2811_p8), %s2464_s3, 3 }
  0xc4   : > { %s470_s8 = scalar_lea.sflag (!%p2811_p8), [#allocation3], %s2464_s3  ;;  %s473_s20 = scalar_lea.vmem (!%p2811_p8), [#allocation2], %s2467_s4 }
  0xca   : > { %2074 = dma.done.wait (%p2812_p11), %s470_s8, 128  }
  0xcb   : > { %2076 = vsyncadd (%p2812_p11), %s470_s8, 4294967168  ;;  %s478_s9 = sand.u32 1, %s2233_s23   ;;  %s482_s24 = scalar_lea.vmem [#allocation5], %s2467_s4 }
  0xcc   : > { %s479_s27 = scalar_lea.sflag [#allocation6], %s478_s9 }
  0xcd   : > { %2078 = dma.done.wait (%p2812_p11), %s479_s27, 256  }
  0xce   : > { %2080 = vsyncadd (%p2812_p11), %s479_s27, 4294967040  ;;  %s491_s28 = scalar_lea.vmem [#allocation7], %s2467_s4  ;;  %p2813_p10 = scmp.eq.s32.totalorder %s2233_s23, 0 }
  0xd0   : > { %2082 = dma.done.wait (%p2813_p10), [#allocation9], 1024   ;;  %p2814_p5 = pmov %p2813_p10 }
  0xd2   : > { %2084 = vsyncadd (%p2814_p5), [#allocation9], 4294966272  ;;  %p2815_p9 = pmov %p2814_p5 }
  0xd3   : > { %p2816_p2 = pmov %p2814_p5 }
  0xd4   : > { %2086 = dma.done.wait (%p2815_p9), [#allocation12], 512  }
  0xd5   : > { %2088 = vsyncadd (%p2816_p2), [#allocation12], 4294966784  ;;  %v2129_v0 = vmov 0.0|0.0   ;;  %vm2130_vm0 = vmmov 0   ;;  %v2131_v1 = vmov 0.0   ;;  %v800_v2 = vld [vmem:[#allocation10] sm:$0xff]  ;;  %v663_v37 = vlaneseq }
  0xd6   : > { %1654 = vmatprep.subr.bf16.mxu1 %v2129_v0  ;;  %1648 = vmatprep.subr.bf16.mxu0 %v2129_v0  ;;  %v801_v3 = vld [vmem:[#allocation10 + $0x8] sm:$0xff]  ;;  %v563_v4 = vld [vmem:[#allocation8] sm:$0xff]  ;;  %v802_v7 = vld [vmem:[#allocation10 + $0x10] sm:$0xff]  ;;  %vm574_vm1 = vcmask 261120   ;;  %s2817_s1 = sld [smem:[#allocation33_spill]]  ;;  %s2132_s21 = smov 104  }
  0xd7   : > { %1634 = vmatprep.mubr.msk.f32.mxu1 %vm2130_vm0, %v2131_v1  ;;  %1623 = vmatprep.mubr.msk.f32.mxu0 %vm2130_vm0, %v2131_v1  ;;  %v1655_v5 = vpack.c.bf16 %v801_v3, %v800_v2  ;;  %v564_v6 = vld [vmem:[#allocation8 + $0x8] sm:$0xff]  ;;  %v803_v8 = vld [vmem:[#allocation10 + $0x18] sm:$0xff]  ;;  %v565_v10 = vld [vmem:[#allocation8 + $0x10] sm:$0xff]  ;;  %s2133_s15 = smov 120   ;;  %s2134_s11 = smov 112   ;;  %v664_v41 = vshrl.u32 %v663_v37, 7 }
  0xd8   : > { %v1649_v9 = vpack.c.bf16 %v564_v6, %v563_v4  ;;  %v566_v11 = vld [vmem:[#allocation8 + $0x18] sm:$0xff]  ;;  %v1658_v12 = vpack.c.bf16 %v803_v8, %v802_v7  ;;  %v1035_v14 = vld [vmem:[#allocation11] sm:$0xff]  ;;  %v1036_v15 = vld [vmem:[#allocation11 + $0x8] sm:$0xff]  ;;  %s2818_s12 = sld [smem:[#allocation34_spill]]  ;;  %v2135_v35 = vmov 1983009808  }
  0xd9   : > { %1656 = vmatpush3.bf16.msra.mxu1 %v1655_v5  ;;  %v1652_v13 = vpack.c.bf16 %v566_v11, %v565_v10  ;;  %v799_v16 = vld [vmem:[%s482_s24] sm:$0xff]  ;;  %v562_v17 = vld [vmem:[%s473_s20] sm:$0xff]  ;;  %v1661_v18 = vpack.c.bf16 %v1036_v15, %v1035_v14  ;;  %v661_v36 = vunpack.c.l.s4 %v2135_v35  ;;  %v2136_v38 = vmov 1934713408   ;;  %s2537_s29 = sshll.u32 %s2464_s3, 5  ;;  %s2819_s26 = sld [smem:[#allocation24_spill]] }
  0xda   : > { %1650 = vmatpush3.bf16.msra.mxu0 %v1649_v9  ;;  %1657 = vmatprep.subr.bf16.mxu1 %v2129_v0  ;;  %v1037_v19 = vld [vmem:[#allocation11 + $0x10] sm:$0xff]  ;;  %v1038_v20 = vld [vmem:[#allocation11 + $0x18] sm:$0xff]  ;;  %v693_v39 = vunpack.c.l.s4 %v2136_v38  ;;  %vm794_vm2 = vcmask 64512   ;;  %s554_s14 = scalar_lea.vmem [#allocation14], %s2537_s29  ;;  %s2820_s27 = sld [smem:[#allocation36_spill]] }
  0xdb   : > { %1651 = vmatprep.subr.bf16.mxu0 %v2129_v0  ;;  %v1664_v21 = vpack.c.bf16 %v1038_v20, %v1037_v19  ;;  %v1034_v22 = vld [vmem:[%s491_s28] sm:$0xff]  ;;  %v662_v40 = vunpack.c.0.s8 %v661_v36  ;;  %s1311_s4 = sshll.u32 %s554_s14, 4  ;;  %s2821_s28 = sld [smem:[#allocation29_spill]]  ;;  %s2565_s4 = int_to_ptr.vmem [resolvable:$true] %s1311_s4 }
  0xdc   : > { %v1578_v23 = vld [vmem:[%s2742_s6] ss:$0 sm:$0xff]  ;;  %v694_v44 = vunpack.c.0.s8 %v693_v39  ;;  %s2576_s25 = scalar_lea.vmem [#allocation13], %s2537_s29  ;;  %s2585_s16 = scalar_lea.sflag [#allocation15], %s478_s9 }
  0xdd   : > { %1659 = vmatpush3.bf16.msra.mxu1 %v1658_v12  ;;  %v1574_v25 = vld [vmem:[%s2817_s1] ss:$0 sm:$0xff]  ;;  %v2518_v45 = vsub.s32 %v662_v40, %v664_v41  ;;  %s1294_s30 = sshll.u32 %s2576_s25, 4  ;;  %s1965_s17 = scalar_lea.vmem %s2565_s4, 512  ;;  %s2624_s30 = int_to_ptr.vmem [resolvable:$true] %s1294_s30 }
  0xde   : > { %1653 = vmatpush3.bf16.msra.mxu0 %v1652_v13  ;;  %v1582_v31 = vld [vmem:[%s2818_s12] ss:$0 sm:$0xff]  ;;  %v2520_v52 = vsub.s32 %v694_v44, %v664_v41  ;;  %p1966_p4 = scmp.ne.s32.totalorder %s2565_s4, %s1965_s17  ;;  %s2137_s1 = smov [#allocation14]  }
  0xdf   : > { %1660 = vmatprep.subr.bf16.mxu0 %v2129_v0  ;;  %s2548_s10 = sshll.u32 %s2819_s26, 9 }
  0xe0   : > { %1635 = vmatmul.mubr.msk.f32.vlgmr.msra.gmra.mrb[0].mxu1 %vm574_vm1, %v799_v16  ;;  %s2563_s24 = scalar_lea.hbm %s2820_s27, %s2548_s10 }
  0xe1   : > { %1624 = vmatmul.mubr.msk.f32.vlgmr.msra.gmra.mrb[0].mxu0 %vm574_vm1, %v562_v17  ;;  %p2822_p7 = scmp.ne.s32.totalorder %s2821_s28, 0 }
  0xe2   : > { %1662 = vmatpush3.bf16.msra.mxu0 %v1661_v18  ;;  %1645 = vmatprep.mubr.msk.f32.mxu0 %vm2130_vm0, %v2131_v1 }
  0xe3   : > { %1663 = vmatprep.subr.bf16.mxu0 %v2129_v0  ;;  %p1967_p3 = pnand %p1966_p4, %p2822_p7 }
  0xe5   : > { %p1968_p1 = pneg %p1967_p3 }
  0xe6   : > { %1665 = vmatpush3.bf16.msra.mxu0 %v1664_v21 }
  0xe9   : > { %1646 = vmatmul.mubr.msk.f32.vlgmr.msra.gmra.mrb[2].mxu0 %vm574_vm1, %v1034_v22 }
 0x1b3   : > { %v880_v24 = vpop.f32.mrb[0].mxu1 }
 0x1b4   : > { %v881_v26 = vadd.f32 %v1578_v23, %v880_v24  ;;  %v1636_v27 = vpop.f32.mrb[1].mxu1  ;;  %v644_v28 = vpop.f32.mrb[0].mxu0 }
 0x1b5   : > { %v1625_v29 = vpop.f32.mrb[1].mxu0  ;;  %v645_v30 = vadd.f32 %v1574_v25, %v644_v28 }
 0x1b6   : > { %891 = vrot.lane.b32.xlu1 %v881_v26, %s2132_s21  ;;  %885 = vrot.lane.b32.xlu0 %v881_v26, %s2133_s15 }
 0x1ba   : > { %888 = vrot.lane.b32.xlu0 %v881_v26, %s2134_s11  ;;  %649 = vrot.lane.b32.xlu1 %v645_v30, %s2133_s15 }
 0x1bc   : > { %v1115_v32 = vpop.f32.mrb[2].mxu0 }
 0x1bd   : > { %v1647_v33 = vpop.f32.mrb[3].mxu0  ;;  %v2513_v34 = vadd.f32 %v1582_v31, %v1115_v32 }
 0x1be   : > { %652 = vrot.lane.b32.xlu0 %v645_v30, %s2134_s11  ;;  %655 = vrot.lane.b32.xlu1 %v645_v30, %s2132_s21 }
 0x1c2   : > { %1123 = vrot.lane.b32.xlu1 %v2513_v34, %s2134_s11  ;;  %1120 = vrot.lane.b32.xlu0 %v2513_v34, %s2133_s15 }
 0x1c6   : > { %1126 = vrot.lane.b32.xlu0 %v2513_v34, %s2132_s21  ;;  %s1969_s21 = sshll.u32 %s2137_s1, 4  ;;  %s1970_s21 = int_to_ptr.vmem [resolvable:$false] %s1969_s21 }
 0x1c7   : > { %s1971_s15 = scalar_lea.vmem %s1970_s21, 1024  ;;  %p1972_p13 = scmp.lt.s32.totalorder %s2565_s4, %s1970_s21 }
 0x1c8   : > { %p1973_p6 = scmp.lt.s32.totalorder %s1971_s15, %s1965_s17 }
 0x1ca   : > { %p1974_p0 = por %p1973_p6, %p1972_p13 }
 0x1cc   : > { %p1975_p12 = pnand %p1974_p0, %p1968_p1 }
 0x228   : > { %v892_v42 = vpop.permute.xlu1 %891  ;;  %v886_v43 = vpop.permute.xlu0 %885 }
 0x229   : > { %v910_v46 = vcombine.low %v886_v43, %v892_v42  ;;  %v911_v47 = vcombine.high %v886_v43, %v892_v42 }
 0x22b   : > { %v918_v53 = vrot.slane %v910_v46, %v2518_v45  ;;  %v925_v54 = vrot.slane %v911_v47, %v2518_v45 }
 0x22c   : > { %v889_v48 = vpop.permute.xlu0 %888  ;;  %v650_v49 = vpop.permute.xlu1 %649 }
 0x22d   : > { %v894_v50 = vcombine.low %v881_v26, %v889_v48  ;;  %v895_v51 = vcombine.high %v881_v26, %v889_v48 }
 0x22f   : > { %v902_v55 = vrot.slane %v894_v50, %v2518_v45  ;;  %v909_v56 = vrot.slane %v895_v51, %v2518_v45 }
 0x230   : > { %v653_v57 = vpop.permute.xlu0 %652  ;;  %v656_v58 = vpop.permute.xlu1 %655 }
 0x231   : > { %v926_v59 = vcombine.low %v902_v55, %v918_v53  ;;  %v927_v60 = vcombine.high %v902_v55, %v918_v53  ;;  %v942_v61 = vcombine.low %v909_v56, %v925_v54  ;;  %v943_v62 = vcombine.high %v909_v56, %v925_v54 }
 0x232   : > { %v658_v63 = vcombine.low %v645_v30, %v653_v57  ;;  %v659_v0 = vcombine.high %v645_v30, %v653_v57  ;;  %v674_v1 = vcombine.low %v650_v49, %v656_v58  ;;  %v675_v2 = vcombine.high %v650_v49, %v656_v58 }
 0x233   : > { %v934_v3 = vrot.slane %v926_v59, %v2520_v52  ;;  %v941_v4 = vrot.slane %v927_v60, %v2520_v52  ;;  %v950_v5 = vrot.slane %v942_v61, %v2520_v52  ;;  %v957_v6 = vrot.slane %v943_v62, %v2520_v52 }
 0x234   : > { %v666_v7 = vrot.slane %v658_v63, %v2518_v45  ;;  %v673_v8 = vrot.slane %v659_v0, %v2518_v45  ;;  %v682_v9 = vrot.slane %v674_v1, %v2518_v45  ;;  %v689_v10 = vrot.slane %v675_v2, %v2518_v45  ;;  %v2534_v19 = vpop.permute.xlu0 %1120  ;;  %v1124_v46 = vpop.permute.xlu1 %1123 }
 0x235   : > { %v962_v11 = vcombine.low %v934_v3, %v941_v4  ;;  %v1580_v12 = vcombine.high %v934_v3, %v941_v4  ;;  %v978_v13 = vcombine.low %v950_v5, %v957_v6  ;;  %v1581_v14 = vcombine.high %v950_v5, %v957_v6 }
 0x236   : > { %v690_v15 = vcombine.low %v666_v7, %v682_v9  ;;  %v691_v16 = vcombine.high %v666_v7, %v682_v9  ;;  %v706_v17 = vcombine.low %v673_v8, %v689_v10  ;;  %v707_v18 = vcombine.high %v673_v8, %v689_v10 }
 0x237   : > { %v969_v20 = vrot.slane %v962_v11, %v2518_v45  ;;  %v977_v21 = vrot.slane %v1580_v12, %v2518_v45  ;;  %v985_v22 = vrot.slane %v978_v13, %v2518_v45  ;;  %v993_v23 = vrot.slane %v1581_v14, %v2518_v45 }
 0x238   : > { %v698_v24 = vrot.slane %v690_v15, %v2520_v52  ;;  %v705_v25 = vrot.slane %v691_v16, %v2520_v52  ;;  %v714_v26 = vrot.slane %v706_v17, %v2520_v52  ;;  %v721_v27 = vrot.slane %v707_v18, %v2520_v52  ;;  %v1127_v47 = vpop.permute.xlu0 %1126 }
 0x239   : > { %v994_v28 = vcombine.low %v969_v20, %v977_v21  ;;  %v995_v29 = vcombine.high %v969_v20, %v977_v21  ;;  %v1010_v30 = vcombine.low %v985_v22, %v993_v23  ;;  %v1011_v31 = vcombine.high %v985_v22, %v993_v23 }
 0x23a   : > { %v726_v32 = vcombine.low %v698_v24, %v705_v25  ;;  %v1576_v33 = vcombine.high %v698_v24, %v705_v25  ;;  %v742_v35 = vcombine.low %v714_v26, %v721_v27  ;;  %v1577_v36 = vcombine.high %v714_v26, %v721_v27 }
 0x23b   : > { %v1002_v37 = vrot.slane %v994_v28, %v2520_v52  ;;  %v1009_v38 = vrot.slane %v995_v29, %v2520_v52  ;;  %v1018_v39 = vrot.slane %v1010_v30, %v2520_v52  ;;  %v1025_v40 = vrot.slane %v1011_v31, %v2520_v52 }
 0x23c   : > { %v733_v41 = vrot.slane %v726_v32, %v2518_v45  ;;  %v741_v42 = vrot.slane %v1576_v33, %v2518_v45  ;;  %v749_v43 = vrot.slane %v742_v35, %v2518_v45  ;;  %v757_v44 = vrot.slane %v1577_v36, %v2518_v45 }
 0x23d   : > { %v1026_v48 = vcombine.low %v1002_v37, %v1018_v39  ;;  %v1027_v49 = vcombine.high %v1002_v37, %v1018_v39  ;;  %v1028_v50 = vcombine.low %v1009_v38, %v1025_v40  ;;  %v1029_v51 = vcombine.high %v1009_v38, %v1025_v40 }
 0x23e   : > { %v758_v53 = vcombine.low %v733_v41, %v741_v42  ;;  %v759_v54 = vcombine.high %v733_v41, %v741_v42  ;;  %v774_v55 = vcombine.low %v749_v43, %v757_v44  ;;  %v775_v56 = vcombine.high %v749_v43, %v757_v44 }
 0x23f   : > { %v1129_v57 = vcombine.low %v2513_v34, %v1124_v46  ;;  %v1130_v58 = vcombine.high %v2513_v34, %v1124_v46  ;;  %v1145_v59 = vcombine.low %v2534_v19, %v1127_v47  ;;  %v1146_v60 = vcombine.high %v2534_v19, %v1127_v47  ;;  %1030 = vst.msk [vmem:[%s554_s14] sm:$0xff] %vm794_vm2, %v1026_v48 }
 0x240   : > { %1031 = vst.msk [vmem:[%s554_s14 + $0x8] sm:$0xff] %vm794_vm2, %v1027_v49  ;;  %1032 = vst.msk [vmem:[%s554_s14 + $0x10] sm:$0xff] %vm794_vm2, %v1028_v50  ;;  %v766_v34 = vrot.slane %v758_v53, %v2520_v52  ;;  %v773_v61 = vrot.slane %v759_v54, %v2520_v52  ;;  %v782_v62 = vrot.slane %v774_v55, %v2520_v52 }
 0x241   : > { %1033 = vst.msk [vmem:[%s554_s14 + $0x18] sm:$0xff] %vm794_vm2, %v1029_v51  ;;  %v789_v63 = vrot.slane %v775_v56, %v2520_v52 }
 0x242   : > { %1978 = shalt.err (!%p1975_p12)
}
 0x243   : > { %s1979_s23 = scalar_lea.hbm %s2563_s24, 512  ;;  %s1983_s13 = scalar_lea.hbm %s2820_s27, 1024 }
 0x244   : > { %p1980_p8 = scmp.ne.s32.totalorder %s2563_s24, %s1979_s23  ;;  %p1984_p5 = scmp.lt.u32.totalorder %s2563_s24, %s2820_s27 }
 0x245   : > { %p1985_p9 = scmp.lt.u32.totalorder %s1983_s13, %s1979_s23  ;;  %p1987_p4 = scmp.lt.u32.totalorder %s1979_s23, %s2563_s24 }
 0x246   : > { %p1981_p11 = pnand %p1980_p8, %p2822_p7 }
 0x247   : > { %p1986_p2 = por %p1985_p9, %p1984_p5 }
 0x248   : > { %p1982_p10 = pneg %p1981_p11 }
 0x249   : > { %p1988_p3 = por %p1987_p4, %p1986_p2 }
 0x24b   : > { %p1989_p1 = pnand %p1988_p3, %p1982_p10 }
 0x24d   : > { %1992 = shalt.err (!%p1989_p1)
}
 0x24e   : > { %s2138_s26 = smov 128   ;;  %s2139_s14 = smov 8   ;;  %v1137_v0 = vrot.slane %v1129_v57, %v2518_v45  ;;  %v1144_v1 = vrot.slane %v1130_v58, %v2518_v45  ;;  %v1153_v2 = vrot.slane %v1145_v59, %v2518_v45  ;;  %v1160_v3 = vrot.slane %v1146_v60, %v2518_v45 }
 0x24f   : > { %1685 = dma.vmem_to_hbm [thread:$0]  (%p2822_p7), %s2565_s4, 512, %s2563_s24, %s2585_s16, %s2138_s26, %s2138_s26, %s2139_s14   ;;  %v790_v4 = vcombine.low %v766_v34, %v782_v62  ;;  %v791_v5 = vcombine.high %v766_v34, %v782_v62  ;;  %v792_v6 = vcombine.low %v773_v61, %v789_v63  ;;  %v793_v7 = vcombine.high %v773_v61, %v789_v63 }
 0x250   : > { %s2823_s17 = sld [smem:[#allocation35_spill]]  ;;  %v1161_v8 = vcombine.low %v1137_v0, %v1153_v2  ;;  %v1162_v9 = vcombine.high %v1137_v0, %v1153_v2  ;;  %v1177_v10 = vcombine.low %v1144_v1, %v1160_v3  ;;  %v1178_v11 = vcombine.high %v1144_v1, %v1160_v3  ;;  %s1270_s24 = scalar_lea.sflag [#allocation4], %s2464_s3 }
 0x251   : > { %795 = vst.msk [vmem:[%s2576_s25] sm:$0xff] %vm794_vm2, %v790_v4  ;;  %796 = vst.msk [vmem:[%s2576_s25 + $0x8] sm:$0xff] %vm794_vm2, %v791_v5  ;;  %s1993_s21 = scalar_lea.vmem %s2624_s30, 512  ;;  %s2140_s15 = smov [#allocation13]  }
 0x252   : > { %797 = vst.msk [vmem:[%s2576_s25 + $0x10] sm:$0xff] %vm794_vm2, %v792_v6  ;;  %798 = vst.msk [vmem:[%s2576_s25 + $0x18] sm:$0xff] %vm794_vm2, %v793_v7  ;;  %v1169_v12 = vrot.slane %v1161_v8, %v2520_v52  ;;  %v1176_v13 = vrot.slane %v1162_v9, %v2520_v52  ;;  %v1185_v14 = vrot.slane %v1177_v10, %v2520_v52  ;;  %p1994_p13 = scmp.ne.s32.totalorder %s2624_s30, %s1993_s21  ;;  %s1997_s23 = sshll.u32 %s2140_s15, 4  ;;  %s1998_s23 = int_to_ptr.vmem [resolvable:$false] %s1997_s23 }
 0x253   : > { %v1192_v15 = vrot.slane %v1178_v11, %v2520_v52  ;;  %s1999_s9 = scalar_lea.vmem %s1998_s23, 1024  ;;  %p2000_p12 = scmp.lt.s32.totalorder %s2624_s30, %s1998_s23 }
 0x254   : > { %p1995_p6 = pnand %p1994_p13, %p2822_p7  ;;  %p2001_p8 = scmp.lt.s32.totalorder %s1999_s9, %s1993_s21 }
 0x256   : > { %s2824_s1 = smov %s2823_s17  ;;  %s2620_s4 = scalar_lea.hbm %s2823_s17, %s2548_s10 }
 0x257   : > { %p1996_p0 = pneg %p1995_p6  ;;  %p2002_p11 = por %p2001_p8, %p2000_p12 }
 0x259   : > { %p2003_p10 = pnand %p2002_p11, %p1996_p0 }
 0x25b   : > { %2006 = shalt.err (!%p2003_p10)
}
 0x25c   : > { %s2007_s25 = scalar_lea.hbm %s2620_s4, 512  ;;  %s2011_s22 = scalar_lea.hbm %s2824_s1, 1024 }
 0x25d   : > { %p2008_p5 = scmp.ne.s32.totalorder %s2620_s4, %s2007_s25  ;;  %p2012_p4 = scmp.lt.u32.totalorder %s2620_s4, %s2824_s1 }
 0x25e   : > { %p2013_p3 = scmp.lt.u32.totalorder %s2011_s22, %s2007_s25  ;;  %p2015_p13 = scmp.lt.u32.totalorder %s2007_s25, %s2620_s4 }
 0x25f   : > { %p2009_p9 = pnand %p2008_p5, %p2822_p7 }
 0x260   : > { %p2014_p1 = por %p2013_p3, %p2012_p4 }
 0x261   : > { %p2010_p2 = pneg %p2009_p9 }
 0x262   : > { %p2016_p6 = por %p2015_p13, %p2014_p1 }
 0x264   : > { %p2017_p0 = pnand %p2016_p6, %p2010_p2 }
 0x266   : > { %2020 = shalt.err (!%p2017_p0)
}
 0x267   : > { %1684 = dma.vmem_to_hbm [thread:$0]  (%p2822_p7), %s2624_s30, 512, %s2620_s4, %s1270_s24, %s2138_s26, %s2138_s26, %s2139_s14   ;;  %v1197_v16 = vcombine.low %v1169_v12, %v1176_v13  ;;  %v1584_v17 = vcombine.high %v1169_v12, %v1176_v13  ;;  %v1213_v18 = vcombine.low %v1185_v14, %v1192_v15  ;;  %v1585_v19 = vcombine.high %v1185_v14, %v1192_v15 }
 0x268   : > { %s561_s3 = scalar_lea.vmem [#allocation16], %s2537_s29  ;;  %s2825_s4 = sld [smem:[#allocation37_spill]] }
 0x269   : > { %v1204_v20 = vrot.slane %v1197_v16, %v2518_v45  ;;  %v1212_v21 = vrot.slane %v1584_v17, %v2518_v45  ;;  %v1220_v22 = vrot.slane %v1213_v18, %v2518_v45  ;;  %v1228_v23 = vrot.slane %v1585_v19, %v2518_v45  ;;  %s1328_s20 = sshll.u32 %s561_s3, 4  ;;  %s2680_s20 = int_to_ptr.vmem [resolvable:$true] %s1328_s20 }
 0x26a   : > { %s2021_s29 = scalar_lea.vmem %s2680_s20, 512 }
 0x26b   : > { %v1229_v24 = vcombine.low %v1204_v20, %v1212_v21  ;;  %v1230_v25 = vcombine.high %v1204_v20, %v1212_v21  ;;  %v1245_v26 = vcombine.low %v1220_v22, %v1228_v23  ;;  %v1246_v27 = vcombine.high %v1220_v22, %v1228_v23  ;;  %p2022_p12 = scmp.ne.s32.totalorder %s2680_s20, %s2021_s29 }
 0x26d   : > { %v1237_v28 = vrot.slane %v1229_v24, %v2520_v52  ;;  %v1244_v29 = vrot.slane %v1230_v25, %v2520_v52  ;;  %v1253_v30 = vrot.slane %v1245_v26, %v2520_v52  ;;  %v1260_v31 = vrot.slane %v1246_v27, %v2520_v52  ;;  %p2023_p8 = pnand %p2022_p12, %p2822_p7 }
 0x26e   : > { %s2678_s24 = scalar_lea.hbm %s2825_s4, %s2548_s10  ;;  %s2141_s10 = smov [#allocation16]  }
 0x26f   : > { %v1261_v32 = vcombine.low %v1237_v28, %v1253_v30  ;;  %v1262_v33 = vcombine.high %v1237_v28, %v1253_v30  ;;  %v1263_v35 = vcombine.low %v1244_v29, %v1260_v31  ;;  %v1264_v36 = vcombine.high %v1244_v29, %v1260_v31  ;;  %p2024_p11 = pneg %p2023_p8  ;;  %s2025_s21 = sshll.u32 %s2141_s10, 4  ;;  %s2026_s21 = int_to_ptr.vmem [resolvable:$false] %s2025_s21 }
 0x270   : > { %s2027_s15 = scalar_lea.vmem %s2026_s21, 1024  ;;  %p2028_p10 = scmp.lt.s32.totalorder %s2680_s20, %s2026_s21 }
 0x271   : > { %1265 = vst.msk [vmem:[%s561_s3] sm:$0xff] %vm794_vm2, %v1261_v32  ;;  %1266 = vst.msk [vmem:[%s561_s3 + $0x8] sm:$0xff] %vm794_vm2, %v1262_v33  ;;  %p2029_p5 = scmp.lt.s32.totalorder %s2027_s15, %s2021_s29 }
 0x272   : > { %1267 = vst.msk [vmem:[%s561_s3 + $0x10] sm:$0xff] %vm794_vm2, %v1263_v35  ;;  %1268 = vst.msk [vmem:[%s561_s3 + $0x18] sm:$0xff] %vm794_vm2, %v1264_v36 }
 0x273   : > { %p2030_p9 = por %p2029_p5, %p2028_p10 }
 0x275   : > { %p2031_p2 = pnand %p2030_p9, %p2024_p11 }
 0x277   : > { %2034 = shalt.err (!%p2031_p2)
}
 0x278   : > { %s2035_s23 = scalar_lea.hbm %s2678_s24, 512  ;;  %s2039_s11 = scalar_lea.hbm %s2825_s4, 1024 }
 0x279   : > { %p2036_p4 = scmp.ne.s32.totalorder %s2678_s24, %s2035_s23  ;;  %p2040_p13 = scmp.lt.u32.totalorder %s2678_s24, %s2825_s4 }
 0x27a   : > { %p2041_p6 = scmp.lt.u32.totalorder %s2039_s11, %s2035_s23  ;;  %p2043_p12 = scmp.lt.u32.totalorder %s2035_s23, %s2678_s24 }
 0x27b   : > { %p2037_p3 = pnand %p2036_p4, %p2822_p7 }
 0x27c   : > { %p2042_p0 = por %p2041_p6, %p2040_p13 }
 0x27d   : > { %p2038_p1 = pneg %p2037_p3 }
 0x27e   : > { %p2044_p8 = por %p2043_p12, %p2042_p0 }
 0x280   : > { %p2045_p11 = pnand %p2044_p8, %p2038_p1 }
 0x282   : > { %2048 = shalt.err (!%p2045_p11)
}
 0x283   : > { %1686 = dma.vmem_to_hbm [thread:$0]  (%p2822_p7), %s2680_s20, 512, %s2678_s24, %s2585_s16, %s2138_s26, %s2138_s26, %s2139_s14  }
 0x284 PF: > { %s2826_s12 = sld [smem:[#allocation23_spill]]  ;;  %s2827_s8 = sld [smem:[#allocation27_spill]] }
 0x285   : > { %s2828_s3 = sld [smem:[#allocation26_spill]] }
 0x28a   : > { %s1343_s30 = sand.u32 1, %s2826_s12   ;;  %p2829_p10 = scmp.ne.s32.totalorder %s2827_s8, 0 }
 0x28b   : > { %p2830_p5 = scmp.ge.s32.totalorder %s2828_s3, 2  ;;  %s1344_s17 = scalar_lea.sflag [#allocation4], %s1343_s30 }
 0x28d   : > { %p1711_p9 = pnand %p2830_p5, %p2829_p10 }
 0x28f   : > { %2090 = dma.done.wait (!%p1711_p9), %s1344_s17, 512  }
 0x290   : > { %2092 = vsyncadd (!%p1711_p9), %s1344_s17, 4294966784  ;;  %s2831_s28 = sadd.s32 4294967294, %s2828_s3  }
 0x291   : > { %s1352_s29 = sand.u32 1, %s2831_s28  }
 0x292   : > { %s1353_s10 = scalar_lea.sflag [#allocation15], %s1352_s29 }
 0x293   : > { %2094 = dma.done.wait (!%p1711_p9), %s1353_s10, 1024  }
 0x294   : > { %2096 = vsyncadd (!%p1711_p9), %s1353_s10, 4294966272  ;;  %s36_s22 = sadd.s32 1, %s2828_s3   ;;  %s2832_s16 = sld [smem:[#allocation30_spill]] }
 0x295   : > { %p33_p7 = scmp.ge.s32.totalorder %s36_s22, 4   ;;  %s2833_s20 = sld [smem:[#allocation25_spill]] }
 0x296   : > { %s2834_s21 = sld [smem:[#allocation28_spill]]  ;;  %s2835_s17 = smov %s2103_s18 }
 0x297   : > { %s2836_s18 = smov %s2107_s19  ;;  %35 = sbr.rel (!%p33_p7) target bundleno = 20 (0x14), region = 169 }
 0x29a   : > { %s2837_s19 = smov %s2832_s16 }
 0x29e   :  { %1367 = vsyncpa [#allocation3], 1 }
 0x29f   :  { %1369 = vsyncpa [#allocation3 + $0x1], 1 }
 0x2a0   :  { %1370 = vsyncpa [#allocation6], 1 }
 0x2a1   :  { %1372 = vsyncpa [#allocation6 + $0x1], 1 }
 0x2a2   :  { %1373 = vsyncpa [#allocation9], 1 }
 0x2a3   :  { %1374 = vsyncpa [#allocation12], 1 }
 0x2a4   :  { %1375 = vsyncpa [#allocation4], 1 }
 0x2a5   :  { %1377 = vsyncpa [#allocation4 + $0x1], 1 }
 0x2a6   :  { %1378 = vsyncpa [#allocation15], 1 }
 0x2a7   :  { %1380 = vsyncpa [#allocation15 + $0x1], 1 }

// kernel: tpu_custom_call.1
= control target key start
LH: loop header
LB: loop body
LE: loop exit
PB: predicated region body
PF: predicated region fallthrough
CT: control target
= control target key end

     0   :  { %s2736_s0 = inlined_call_operand.hbm [shape: f32[2,8,32], index: 0, kind: input, shape index: {}]   ;;  %s2737_s1 = inlined_call_operand.hbm [shape: f32[2,8,32], index: 1, kind: input, shape index: {}]   ;;  %s2738_s2 = inlined_call_operand.hbm [shape: f32[2,8,32], index: 2, kind: input, shape index: {}]   ;;  %s2739_s3 = inlined_call_operand.hbm [shape: f32[32,32], index: 3, kind: input, shape index: {}]   ;;  %s2740_s4 = inlined_call_operand.vmem [shape: f32[1,32], index: 4, kind: input, shape index: {}]   ;;  %s2741_s5 = inlined_call_operand.hbm [shape: f32[32,32], index: 5, kind: input, shape index: {}]   ;;  %s2742_s6 = inlined_call_operand.vmem [shape: f32[1,32], index: 6, kind: input, shape index: {}]   ;;  %s2743_s7 = inlined_call_operand.hbm [shape: f32[32,32], index: 7, kind: input, shape index: {}]   ;;  %s2744_s8 = inlined_call_operand.vmem [shape: f32[1,32], index: 8, kind: input, shape index: {}]   ;;  %s2745_s9 = inlined_call_operand.hbm [shape: f32[2,4,8,8], index: 9, kind: output, shape index: {0}]   ;;  %s2746_s10 = inlined_call_operand.hbm [shape: f32[2,4,8,8], index: 10, kind: output, shape index: {1}]   ;;  %s2747_s11 = inlined_call_operand.hbm [shape: f32[2,4,8,8], index: 11, kind: output, shape index: {2}]  }
   0x1   :  { %2777 = sst [smem:[#allocation31_spill]] %s2737_s1 }
   0x2   :  { %2778 = sst [smem:[#allocation32_spill]] %s2739_s3 }
   0x3   :  { %2779 = sst [smem:[#allocation33_spill]] %s2740_s4 }
   0x4   :  { %2780 = sst [smem:[#allocation34_spill]] %s2744_s8 }
   0x5   :  { %2781 = sst [smem:[#allocation35_spill]] %s2745_s9 }
   0x6   :  { %2782 = sst [smem:[#allocation36_spill]] %s2746_s10 }
   0x7   :  { %2783 = sst [smem:[#allocation37_spill]] %s2747_s11 }
   0x8   :  { %17 = vsyncpa [#allocation3], 0 }
   0x9   :  { %19 = vsyncpa [#allocation3 + $0x1], 0 }
   0xa   :  { %20 = vsyncpa [#allocation6], 0 }
   0xb   :  { %22 = vsyncpa [#allocation6 + $0x1], 0 }
   0xc   :  { %23 = vsyncpa [#allocation9], 0 }
   0xd   :  { %24 = vsyncpa [#allocation12], 0 }
   0xe   :  { %25 = vsyncpa [#allocation4], 0 }
   0xf   :  { %27 = vsyncpa [#allocation4 + $0x1], 0 }
  0x10   :  { %28 = vsyncpa [#allocation15], 0 }
  0x11   :  { %30 = vsyncpa [#allocation15 + $0x1], 0  ;;  %s2202_s17 = smov 0   ;;  %s2204_s18 = smov 0  }
  0x12   :  { %s2206_s19 = smov 0   ;;  %s2208_s20 = smov 0  }
  0x13   :  { %s2210_s21 = smov 0   ;;  %s2212_s22 = smov 0  }
  0x14 LB: > { %2784 = sst [smem:[#allocation23_spill]] %s2099_s17  ;;  %s2233_s23 = sadd.s32 4294967295, %s2119_s22   ;;  %s2119_s22 = sphi %s2212_s22, %s36_s22   ;;  %s2115_s21 = sphi %s2210_s21, %s2834_s21   ;;  %s2111_s20 = sphi %s2208_s20, %s2833_s20   ;;  %s2107_s19 = sphi %s2206_s19, %s2837_s19   ;;  %s2103_s18 = sphi %s2204_s18, %s2836_s18   ;;  %s2099_s17 = sphi %s2202_s17, %s2835_s17  }
  0x15   : > { %2785 = sst [smem:[#allocation24_spill]] %s2111_s20  ;;  %s2748_s24 = sadd.s32 4294967294, %s2119_s22  }
  0x16   : > { %2786 = sst [smem:[#allocation25_spill]] %s2115_s21  ;;  %p70_p0 = scmp.ne.s32.totalorder %s2103_s18, %s2099_s17 }
  0x17   : > { %2787 = sst [smem:[#allocation26_spill]] %s2119_s22  ;;  %p2751_p1 = scmp.eq.s32.totalorder %s2233_s23, 0 }
  0x18   : > { %p284_p3 = scmp.eq.s32.totalorder %s2748_s24, 1  ;;  %p1553_p5 = scmp.ge.s32.totalorder %s2119_s22, 1 }
  0x19   : > { %p2244_p4 = por %p2751_p1, %p70_p0  ;;  %p347_p7 = scmp.lt.s32.totalorder %s2119_s22, 3 }
  0x1a   : > { %p2249_p6 = por %p284_p3, %p70_p0  ;;  %s2121_s28 = smov [#allocation8]  }
  0x1b   : > { %s2788_s25 = scalar_select %p2244_p4, 1, 0 }
  0x1c   : > { %s2789_s26 = scalar_select %p2249_p6, 1, 0 }
  0x1d   : > { %p2254_p8 = pnand %p1553_p5, %p347_p7  ;;  %s359_s29 = sshll.u32 %s2121_s28, 4  ;;  %s360_s29 = int_to_ptr.vmem [resolvable:$true] %s359_s29 }
  0x1e   : > { %2790 = sst [smem:[#allocation27_spill]] %s2789_s26  ;;  %s48_s12 = sadd.s32 1, %s2115_s21 }
  0x1f   : > { %s2791_s27 = scalar_select %p2254_p8, 1, 0 }
  0x20   : > { %p1690_p9 = pneg %p2254_p8  ;;  %s2793_s3 = sld [smem:[#allocation32_spill]] }
  0x22   : > { %p2263_p11 = pnand %p1690_p9, %p2751_p1 }
  0x24   : > { %s2792_s30 = scalar_select %p2263_p11, 1, 0 }
  0x25   : > { %p2276_p13 = pneg %p2263_p11 }
  0x26   : > { %s1791_s15 = scalar_lea.hbm %s2793_s3, 512 }
  0x27   : > { %p1792_p12 = scmp.ne.s32.totalorder %s2793_s3, %s1791_s15  ;;  %p1798_p5 = scmp.lt.u32.totalorder %s1791_s15, %s2793_s3 }
  0x28   : > { %s2794_s28 = scalar_select %p2276_p13, 1, 0 }
  0x29   : > { %p1794_p0 = pnand %p2276_p13, %p1792_p12 }
  0x2b   : > { %p1795_p3 = pneg %p1794_p0 }
  0x2d   : > { %p1800_p7 = pnand %p1798_p5, %p1795_p3 }
  0x2f   : > { %1803 = shalt.err (!%p1800_p7)
}
  0x30   : > { %s1804_s13 = scalar_lea.vmem %s360_s29, 512  ;;  %p1812_p2 = scmp.lt.s32.totalorder %s360_s29, %s360_s29 }
  0x31   : > { %p1805_p9 = scmp.ne.s32.totalorder %s360_s29, %s1804_s13  ;;  %p1813_p6 = scmp.lt.s32.totalorder %s1804_s13, %s1804_s13 }
  0x33   : > { %p1807_p10 = pnand %p1805_p9, %p2276_p13  ;;  %p1814_p4 = por %p1813_p6, %p1812_p2 }
  0x35   : > { %p1808_p1 = pneg %p1807_p10 }
  0x37   : > { %p1815_p8 = pnand %p1814_p4, %p1808_p1 }
  0x39   : > { %1818 = shalt.err (!%p1815_p8)
}
  0x3a   : > { %s2755_s24 = smov 128   ;;  %s2757_s17 = smov 8  }
  0x3b   : > { %1693 = dma.hbm_to_vmem [thread:$0]  (!%p2263_p11), %s2793_s3, 512, %s360_s29, [#allocation9], %s2755_s24, %s2755_s24, %s2757_s17  }
  0x3c   : > { %p50_p1 = scmp.ge.s32.totalorder %s48_s12, 2  ;;  %s57_s15 = sadd.s32 1, %s2107_s19 }
  0x3d   : > { %p64_p2 = scmp.ne.s32.totalorder %s2107_s19, %s2103_s18  ;;  %p65_p4 = scmp.eq.s32.totalorder %s2119_s22, 0 }
  0x3e   : > { %s2839_s12 = smov (%p50_p1, %s48_s12), 0  ;;  %p2796_p8 = scmp.eq.s32.totalorder %s2233_s23, 1 }
  0x3f   : > { %2795 = sst [smem:[#allocation28_spill]] %s2839_s12  ;;  %p66_p6 = por %p65_p4, %p64_p2 }
  0x40   : > { %p2303_p10 = por %p2796_p8, %p64_p2  ;;  %s52_s13 = ssub.s32 %s2115_s21, %s2839_s12 }
  0x41   : > { %p1723_p12 = scmp.lt.s32.totalorder %s2119_s22, 2  ;;  %p55_p0 = scmp.eq.s32.totalorder %s52_s13, 0 }
  0x42   : > { %s2797_s16 = scalar_select %p2303_p10, 1, 0 }
  0x43   : > { %s2760_s11 = sand.u32 1, %s2107_s19   ;;  %s2316_s26 = sshll.u32 %s2115_s21, 7 }
  0x44   : > { %2798 = sst [smem:[#allocation29_spill]] %s2797_s16  ;;  %s2313_s29 = sshll.u32 %s2760_s11, 3 }
  0x45   : > { %s2319_s14 = scalar_select %p55_p0, %s2107_s19, %s57_s15  }
  0x46   : > { %p2321_p3 = pnand %p1723_p12, %p66_p6  ;;  %s427_s17 = sand.u32 1, %s2119_s22  }
  0x47   : > { %2799 = sst [smem:[#allocation30_spill]] %s2319_s14  ;;  %s2801_s1 = sld [smem:[#allocation31_spill]] }
  0x48   : > { %s2800_s24 = scalar_select %p2321_p3, 1, 0 }
  0x49   : > { %s431_s11 = scalar_lea.vmem [#allocation5], %s2313_s29  ;;  %s2124_s15 = smov [#allocation10]  }
  0x4a   : > { %s439_s21 = sshll.u32 %s431_s11, 4  ;;  %s2335_s14 = sshll.u32 %s2124_s15, 4  ;;  %s2333_s21 = int_to_ptr.vmem [resolvable:$true] %s439_s21  ;;  %s376_s14 = int_to_ptr.vmem [resolvable:$true] %s2335_s14 }
  0x4b   : > { %s2337_s9 = scalar_lea.sflag [#allocation6], %s427_s17  ;;  %p2343_p7 = pneg %p2321_p3 }
  0x4d   : > { %s2330_s13 = scalar_lea.hbm %s2801_s1, %s2316_s26  ;;  %s1824_s22 = scalar_lea.hbm %s2801_s1, 256 }
  0x4e   : > { %s1819_s16 = scalar_lea.hbm %s2330_s13, 128  ;;  %p1825_p2 = scmp.lt.u32.totalorder %s2330_s13, %s2801_s1 }
  0x4f   : > { %p1820_p5 = scmp.ne.s32.totalorder %s2330_s13, %s1819_s16  ;;  %p1826_p4 = scmp.lt.u32.totalorder %s1824_s22, %s1819_s16 }
  0x50   : > { %s2802_s3 = scalar_select %p2343_p7, 1, 0 }
  0x51   : > { %p1822_p9 = pnand %p2343_p7, %p1820_p5  ;;  %p1827_p6 = por %p1826_p4, %p1825_p2 }
  0x52   : > { %p1828_p8 = scmp.lt.u32.totalorder %s1819_s16, %s2330_s13 }
  0x53   : > { %p1823_p1 = pneg %p1822_p9 }
  0x54   : > { %p1829_p12 = por %p1828_p8, %p1827_p6 }
  0x56   : > { %p1830_p0 = pnand %p1829_p12, %p1823_p1 }
  0x58   : > { %1833 = shalt.err (!%p1830_p0)
}
  0x59   : > { %s1834_s17 = scalar_lea.vmem %s2333_s21, 128  ;;  %s2125_s12 = smov [#allocation5]  }
  0x5a   : > { %p1835_p5 = scmp.ne.s32.totalorder %s2333_s21, %s1834_s17  ;;  %s1839_s11 = sshll.u32 %s2125_s12, 4  ;;  %s1840_s11 = int_to_ptr.vmem [resolvable:$false] %s1839_s11 }
  0x5b   : > { %s1841_s10 = scalar_lea.vmem %s1840_s11, 256  ;;  %p1842_p11 = scmp.lt.s32.totalorder %s2333_s21, %s1840_s11 }
  0x5c   : > { %p1837_p9 = pnand %p1835_p5, %p2343_p7  ;;  %p1843_p13 = scmp.lt.s32.totalorder %s1841_s10, %s1834_s17 }
  0x5e   : > { %p1838_p10 = pneg %p1837_p9  ;;  %p1844_p2 = por %p1843_p13, %p1842_p11 }
  0x60   : > { %p1845_p4 = pnand %p1844_p2, %p1838_p10 }
  0x62   : > { %1848 = shalt.err (!%p1845_p4)
}
  0x63   : > { %1706 = dma.hbm_to_vmem [thread:$0]  (!%p2321_p3), %s2330_s13, 128, %s2333_s21, %s2337_s9  }
  0x64   : > { %s1849_s15 = scalar_lea.hbm %s2741_s5, 512  ;;  %p2803_p11 = scmp.ne.s32.totalorder %s2794_s28, 0 }
  0x65   : > { %p1850_p1 = scmp.ne.s32.totalorder %s2741_s5, %s1849_s15  ;;  %p1856_p6 = scmp.lt.u32.totalorder %s1849_s15, %s2741_s5 }
  0x67   : > { %p1852_p13 = pnand %p1850_p1, %p2803_p11 }
  0x69   : > { %p1853_p10 = pneg %p1852_p13 }
  0x6b   : > { %p1858_p8 = pnand %p1856_p6, %p1853_p10 }
  0x6d   : > { %1861 = shalt.err (!%p1858_p8)
}
  0x6e   : > { %s1862_s10 = scalar_lea.vmem %s376_s14, 512  ;;  %p1870_p9 = scmp.lt.s32.totalorder %s376_s14, %s376_s14 }
  0x6f   : > { %p1863_p12 = scmp.ne.s32.totalorder %s376_s14, %s1862_s10  ;;  %p1871_p2 = scmp.lt.s32.totalorder %s1862_s10, %s1862_s10 }
  0x71   : > { %p1865_p0 = pnand %p1863_p12, %p2803_p11  ;;  %p1872_p4 = por %p1871_p2, %p1870_p9 }
  0x73   : > { %p1866_p5 = pneg %p1865_p0 }
  0x75   : > { %p1873_p3 = pnand %p1872_p4, %p1866_p5 }
  0x77   : > { %1876 = shalt.err (!%p1873_p3)
}
  0x78   : > { %p2804_p1 = scmp.ne.s32.totalorder %s2792_s30, 0  ;;  %s2805_s1 = smov 8  }
  0x79   : > { %s2806_s21 = smov 128   ;;  %s2126_s16 = smov [#allocation11]  }
  0x7a   : > { %1696 = dma.hbm_to_vmem [thread:$0]  (!%p2804_p1), %s2741_s5, 512, %s376_s14, [#allocation9], %s2806_s21, %s2806_s21, %s2805_s1  }
  0x7b   : > { %s391_s15 = sshll.u32 %s2126_s16, 4  ;;  %s1877_s11 = scalar_lea.hbm %s2743_s7, 512  ;;  %s392_s15 = int_to_ptr.vmem [resolvable:$true] %s391_s15 }
  0x7c   : > { %p1878_p3 = scmp.ne.s32.totalorder %s2743_s7, %s1877_s11  ;;  %p1884_p6 = scmp.lt.u32.totalorder %s1877_s11, %s2743_s7 }
  0x7e   : > { %p1880_p13 = pnand %p1878_p3, %p2803_p11 }
  0x80   : > { %p1881_p10 = pneg %p1880_p13 }
  0x82   : > { %p1886_p8 = pnand %p1884_p6, %p1881_p10 }
  0x84   : > { %1889 = shalt.err (!%p1886_p8)
}
  0x85   : > { %s1890_s14 = scalar_lea.vmem %s392_s15, 512  ;;  %p1898_p9 = scmp.lt.s32.totalorder %s392_s15, %s392_s15 }
  0x86   : > { %p1891_p12 = scmp.ne.s32.totalorder %s392_s15, %s1890_s14  ;;  %p1899_p2 = scmp.lt.s32.totalorder %s1890_s14, %s1890_s14 }
  0x88   : > { %p1893_p0 = pnand %p1891_p12, %p2803_p11  ;;  %p1900_p4 = por %p1899_p2, %p1898_p9 }
  0x8a   : > { %p1894_p5 = pneg %p1893_p0 }
  0x8c   : > { %p1901_p7 = pnand %p1900_p4, %p1894_p5 }
  0x8e   : > { %1904 = shalt.err (!%p1901_p7)
}
  0x8f   : > { %1699 = dma.hbm_to_vmem [thread:$0]  (!%p2804_p1), %s2743_s7, 512, %s392_s15, [#allocation12], %s2806_s21, %s2806_s21, %s2805_s1  }
  0x90   : > { %s2414_s13 = scalar_lea.hbm %s2736_s0, %s2316_s26  ;;  %s412_s30 = scalar_lea.vmem [#allocation2], %s2313_s29 }
  0x91   : > { %s420_s22 = sshll.u32 %s412_s30, 4  ;;  %s2807_s16 = sand.u32 1, %s2107_s19   ;;  %s421_s22 = int_to_ptr.vmem [resolvable:$true] %s420_s22 }
  0x92   : > { %s409_s12 = scalar_lea.sflag [#allocation3], %s2807_s16  ;;  %s1905_s17 = scalar_lea.hbm %s2414_s13, 128 }
  0x93   : > { %p1906_p7 = scmp.ne.s32.totalorder %s2414_s13, %s1905_s17  ;;  %p2808_p11 = scmp.ne.s32.totalorder %s2802_s3, 0 }
  0x94   : > { %s1910_s15 = scalar_lea.hbm %s2736_s0, 256  ;;  %p1911_p1 = scmp.lt.u32.totalorder %s2414_s13, %s2736_s0 }
  0x95   : > { %p1908_p3 = pnand %p1906_p7, %p2808_p11  ;;  %p1912_p10 = scmp.lt.u32.totalorder %s1910_s15, %s1905_s17 }
  0x96   : > { %p1914_p8 = scmp.lt.u32.totalorder %s1905_s17, %s2414_s13 }
  0x97   : > { %p1909_p13 = pneg %p1908_p3  ;;  %p1913_p6 = por %p1912_p10, %p1911_p1 }
  0x99   : > { %p1915_p12 = por %p1914_p8, %p1913_p6 }
  0x9b   : > { %p1916_p0 = pnand %p1915_p12, %p1909_p13 }
  0x9d   : > { %1919 = shalt.err (!%p1916_p0)
}
  0x9e   : > { %s1920_s14 = scalar_lea.vmem %s421_s22, 128  ;;  %s2127_s4 = smov [#allocation2]  }
  0x9f   : > { %p1921_p5 = scmp.ne.s32.totalorder %s421_s22, %s1920_s14  ;;  %s1925_s8 = sshll.u32 %s2127_s4, 4  ;;  %s1926_s8 = int_to_ptr.vmem [resolvable:$false] %s1925_s8 }
  0xa0   : > { %s1927_s20 = scalar_lea.vmem %s1926_s8, 256  ;;  %p1928_p4 = scmp.lt.s32.totalorder %s421_s22, %s1926_s8 }
  0xa1   : > { %p1923_p9 = pnand %p1921_p5, %p2808_p11  ;;  %p1929_p7 = scmp.lt.s32.totalorder %s1927_s20, %s1920_s14 }
  0xa3   : > { %p1924_p2 = pneg %p1923_p9  ;;  %p1930_p3 = por %p1929_p7, %p1928_p4 }
  0xa5   : > { %p1931_p1 = pnand %p1930_p3, %p1924_p2 }
  0xa7   : > { %1934 = shalt.err (!%p1931_p1)
}
  0xa8   : > { %p2809_p10 = scmp.ne.s32.totalorder %s2800_s24, 0  ;;  %s2440_s16 = scalar_lea.hbm %s2738_s2, %s2316_s26 }
  0xa9   : > { %s450_s17 = scalar_lea.vmem [#allocation7], %s2313_s29  ;;  %s1935_s21 = scalar_lea.hbm %s2440_s16, 128 }
  0xaa   : > { %1703 = dma.hbm_to_vmem [thread:$0]  (!%p2809_p10), %s2414_s13, 128, %s421_s22, %s409_s12  }
  0xab   : > { %s458_s1 = sshll.u32 %s450_s17, 4  ;;  %p1936_p13 = scmp.ne.s32.totalorder %s2440_s16, %s1935_s21  ;;  %s459_s1 = int_to_ptr.vmem [resolvable:$true] %s458_s1 }
  0xac   : > { %s1940_s13 = scalar_lea.hbm %s2738_s2, 256  ;;  %p1941_p12 = scmp.lt.u32.totalorder %s2440_s16, %s2738_s2 }
  0xad   : > { %p1938_p6 = pnand %p1936_p13, %p2808_p11  ;;  %p1942_p0 = scmp.lt.u32.totalorder %s1940_s13, %s1935_s21 }
  0xae   : > { %p1944_p9 = scmp.lt.u32.totalorder %s1935_s21, %s2440_s16 }
  0xaf   : > { %p1939_p8 = pneg %p1938_p6  ;;  %p1943_p5 = por %p1942_p0, %p1941_p12 }
  0xb1   : > { %p1945_p2 = por %p1944_p9, %p1943_p5 }
  0xb3   : > { %p1946_p4 = pnand %p1945_p2, %p1939_p8 }
  0xb5   : > { %1949 = shalt.err (!%p1946_p4)
}
  0xb6   : > { %s1950_s29 = scalar_lea.vmem %s459_s1, 128  ;;  %s2128_s26 = smov [#allocation7]  }
  0xb7   : > { %p1951_p7 = scmp.ne.s32.totalorder %s459_s1, %s1950_s29  ;;  %s1955_s10 = sshll.u32 %s2128_s26, 4  ;;  %s1956_s10 = int_to_ptr.vmem [resolvable:$false] %s1955_s10 }
  0xb8   : > { %s1957_s14 = scalar_lea.vmem %s1956_s10, 256  ;;  %p1958_p13 = scmp.lt.s32.totalorder %s459_s1, %s1956_s10 }
  0xb9   : > { %p1953_p3 = pnand %p1951_p7, %p2808_p11  ;;  %p1959_p6 = scmp.lt.s32.totalorder %s1957_s14, %s1950_s29 }
  0xbb   : > { %p1954_p1 = pneg %p1953_p3  ;;  %p1960_p10 = por %p1959_p6, %p1958_p13 }
  0xbd   : > { %p1961_p0 = pnand %p1960_p10, %p1954_p1 }
  0xbf   : > { %1964 = shalt.err (!%p1961_p0)
}
  0xc0   : > { %p2810_p12 = scmp.ne.s32.totalorder %s2800_s24, 0  ;;  %p2811_p8 = scmp.ne.s32.totalorder %s2791_s27, 0 }
  0xc1   : > { %s2464_s3 = sand.u32 (!%p2811_p8), 1, %s2103_s18   ;;  %p2812_p11 = scmp.ne.s32.totalorder (!%p2811_p8), %s2788_s25, 0 }
  0xc2   : > { %1709 = dma.hbm_to_vmem [thread:$0]  (!%p2810_p12), %s2440_s16, 128, %s459_s1, %s2337_s9  }
  0xc3   : > { %467 = sbr.rel (%p2811_p8) target bundleno = 644 (0x284), region = 56  ;;  %s2467_s4 = sshll.u32 (!%p2811_p8), %s2464_s3, 3 }
  0xc4   : > { %s470_s8 = scalar_lea.sflag (!%p2811_p8), [#allocation3], %s2464_s3  ;;  %s473_s20 = scalar_lea.vmem (!%p2811_p8), [#allocation2], %s2467_s4 }
  0xca   : > { %2074 = dma.done.wait (%p2812_p11), %s470_s8, 128  }
  0xcb   : > { %2076 = vsyncadd (%p2812_p11), %s470_s8, 4294967168  ;;  %s478_s9 = sand.u32 1, %s2233_s23   ;;  %s482_s24 = scalar_lea.vmem [#allocation5], %s2467_s4 }
  0xcc   : > { %s479_s27 = scalar_lea.sflag [#allocation6], %s478_s9 }
  0xcd   : > { %2078 = dma.done.wait (%p2812_p11), %s479_s27, 256  }
  0xce   : > { %2080 = vsyncadd (%p2812_p11), %s479_s27, 4294967040  ;;  %s491_s28 = scalar_lea.vmem [#allocation7], %s2467_s4  ;;  %p2813_p10 = scmp.eq.s32.totalorder %s2233_s23, 0 }
  0xd0   : > { %2082 = dma.done.wait (%p2813_p10), [#allocation9], 1024   ;;  %p2814_p5 = pmov %p2813_p10 }
  0xd2   : > { %2084 = vsyncadd (%p2814_p5), [#allocation9], 4294966272  ;;  %p2815_p9 = pmov %p2814_p5 }
  0xd3   : > { %p2816_p2 = pmov %p2814_p5 }
  0xd4   : > { %2086 = dma.done.wait (%p2815_p9), [#allocation12], 512  }
  0xd5   : > { %2088 = vsyncadd (%p2816_p2), [#allocation12], 4294966784  ;;  %v2129_v0 = vmov 0.0|0.0   ;;  %vm2130_vm0 = vmmov 0   ;;  %v2131_v1 = vmov 0.0   ;;  %v800_v2 = vld [vmem:[#allocation10] sm:$0xff]  ;;  %v663_v37 = vlaneseq }
  0xd6   : > { %1654 = vmatprep.subr.bf16.mxu1 %v2129_v0  ;;  %1648 = vmatprep.subr.bf16.mxu0 %v2129_v0  ;;  %v801_v3 = vld [vmem:[#allocation10 + $0x8] sm:$0xff]  ;;  %v563_v4 = vld [vmem:[#allocation8] sm:$0xff]  ;;  %v802_v7 = vld [vmem:[#allocation10 + $0x10] sm:$0xff]  ;;  %vm574_vm1 = vcmask 261120   ;;  %s2817_s1 = sld [smem:[#allocation33_spill]]  ;;  %s2132_s21 = smov 104  }
  0xd7   : > { %1634 = vmatprep.mubr.msk.f32.mxu1 %vm2130_vm0, %v2131_v1  ;;  %1623 = vmatprep.mubr.msk.f32.mxu0 %vm2130_vm0, %v2131_v1  ;;  %v1655_v5 = vpack.c.bf16 %v801_v3, %v800_v2  ;;  %v564_v6 = vld [vmem:[#allocation8 + $0x8] sm:$0xff]  ;;  %v803_v8 = vld [vmem:[#allocation10 + $0x18] sm:$0xff]  ;;  %v565_v10 = vld [vmem:[#allocation8 + $0x10] sm:$0xff]  ;;  %s2133_s15 = smov 120   ;;  %s2134_s11 = smov 112   ;;  %v664_v41 = vshrl.u32 %v663_v37, 7 }
  0xd8   : > { %v1649_v9 = vpack.c.bf16 %v564_v6, %v563_v4  ;;  %v566_v11 = vld [vmem:[#allocation8 + $0x18] sm:$0xff]  ;;  %v1658_v12 = vpack.c.bf16 %v803_v8, %v802_v7  ;;  %v1035_v14 = vld [vmem:[#allocation11] sm:$0xff]  ;;  %v1036_v15 = vld [vmem:[#allocation11 + $0x8] sm:$0xff]  ;;  %s2818_s12 = sld [smem:[#allocation34_spill]]  ;;  %v2135_v35 = vmov 1983009808  }
  0xd9   : > { %1656 = vmatpush3.bf16.msra.mxu1 %v1655_v5  ;;  %v1652_v13 = vpack.c.bf16 %v566_v11, %v565_v10  ;;  %v799_v16 = vld [vmem:[%s482_s24] sm:$0xff]  ;;  %v562_v17 = vld [vmem:[%s473_s20] sm:$0xff]  ;;  %v1661_v18 = vpack.c.bf16 %v1036_v15, %v1035_v14  ;;  %v661_v36 = vunpack.c.l.s4 %v2135_v35  ;;  %v2136_v38 = vmov 1934713408   ;;  %s2537_s29 = sshll.u32 %s2464_s3, 5  ;;  %s2819_s26 = sld [smem:[#allocation24_spill]] }
  0xda   : > { %1650 = vmatpush3.bf16.msra.mxu0 %v1649_v9  ;;  %1657 = vmatprep.subr.bf16.mxu1 %v2129_v0  ;;  %v1037_v19 = vld [vmem:[#allocation11 + $0x10] sm:$0xff]  ;;  %v1038_v20 = vld [vmem:[#allocation11 + $0x18] sm:$0xff]  ;;  %v693_v39 = vunpack.c.l.s4 %v2136_v38  ;;  %vm794_vm2 = vcmask 64512   ;;  %s554_s14 = scalar_lea.vmem [#allocation14], %s2537_s29  ;;  %s2820_s27 = sld [smem:[#allocation36_spill]] }
  0xdb   : > { %1651 = vmatprep.subr.bf16.mxu0 %v2129_v0  ;;  %v1664_v21 = vpack.c.bf16 %v1038_v20, %v1037_v19  ;;  %v1034_v22 = vld [vmem:[%s491_s28] sm:$0xff]  ;;  %v662_v40 = vunpack.c.0.s8 %v661_v36  ;;  %s1311_s4 = sshll.u32 %s554_s14, 4  ;;  %s2821_s28 = sld [smem:[#allocation29_spill]]  ;;  %s2565_s4 = int_to_ptr.vmem [resolvable:$true] %s1311_s4 }
  0xdc   : > { %v1578_v23 = vld [vmem:[%s2742_s6] ss:$0 sm:$0xff]  ;;  %v694_v44 = vunpack.c.0.s8 %v693_v39  ;;  %s2576_s25 = scalar_lea.vmem [#allocation13], %s2537_s29  ;;  %s2585_s16 = scalar_lea.sflag [#allocation15], %s478_s9 }
  0xdd   : > { %1659 = vmatpush3.bf16.msra.mxu1 %v1658_v12  ;;  %v1574_v25 = vld [vmem:[%s2817_s1] ss:$0 sm:$0xff]  ;;  %v2518_v45 = vsub.s32 %v662_v40, %v664_v41  ;;  %s1294_s30 = sshll.u32 %s2576_s25, 4  ;;  %s1965_s17 = scalar_lea.vmem %s2565_s4, 512  ;;  %s2624_s30 = int_to_ptr.vmem [resolvable:$true] %s1294_s30 }
  0xde   : > { %1653 = vmatpush3.bf16.msra.mxu0 %v1652_v13  ;;  %v1582_v31 = vld [vmem:[%s2818_s12] ss:$0 sm:$0xff]  ;;  %v2520_v52 = vsub.s32 %v694_v44, %v664_v41  ;;  %p1966_p4 = scmp.ne.s32.totalorder %s2565_s4, %s1965_s17  ;;  %s2137_s1 = smov [#allocation14]  }
  0xdf   : > { %1660 = vmatprep.subr.bf16.mxu0 %v2129_v0  ;;  %s2548_s10 = sshll.u32 %s2819_s26, 9 }
  0xe0   : > { %1635 = vmatmul.mubr.msk.f32.vlgmr.msra.gmra.mrb[0].mxu1 %vm574_vm1, %v799_v16  ;;  %s2563_s24 = scalar_lea.hbm %s2820_s27, %s2548_s10 }
  0xe1   : > { %1624 = vmatmul.mubr.msk.f32.vlgmr.msra.gmra.mrb[0].mxu0 %vm574_vm1, %v562_v17  ;;  %p2822_p7 = scmp.ne.s32.totalorder %s2821_s28, 0 }
  0xe2   : > { %1662 = vmatpush3.bf16.msra.mxu0 %v1661_v18  ;;  %1645 = vmatprep.mubr.msk.f32.mxu0 %vm2130_vm0, %v2131_v1 }
  0xe3   : > { %1663 = vmatprep.subr.bf16.mxu0 %v2129_v0  ;;  %p1967_p3 = pnand %p1966_p4, %p2822_p7 }
  0xe5   : > { %p1968_p1 = pneg %p1967_p3 }
  0xe6   : > { %1665 = vmatpush3.bf16.msra.mxu0 %v1664_v21 }
  0xe9   : > { %1646 = vmatmul.mubr.msk.f32.vlgmr.msra.gmra.mrb[2].mxu0 %vm574_vm1, %v1034_v22 }
 0x1b3   : > { %v880_v24 = vpop.f32.mrb[0].mxu1 }
 0x1b4   : > { %v881_v26 = vadd.f32 %v1578_v23, %v880_v24  ;;  %v1636_v27 = vpop.f32.mrb[1].mxu1  ;;  %v644_v28 = vpop.f32.mrb[0].mxu0 }
 0x1b5   : > { %v1625_v29 = vpop.f32.mrb[1].mxu0  ;;  %v645_v30 = vadd.f32 %v1574_v25, %v644_v28 }
 0x1b6   : > { %891 = vrot.lane.b32.xlu1 %v881_v26, %s2132_s21  ;;  %885 = vrot.lane.b32.xlu0 %v881_v26, %s2133_s15 }
 0x1ba   : > { %888 = vrot.lane.b32.xlu0 %v881_v26, %s2134_s11  ;;  %649 = vrot.lane.b32.xlu1 %v645_v30, %s2133_s15 }
 0x1bc   : > { %v1115_v32 = vpop.f32.mrb[2].mxu0 }
 0x1bd   : > { %v1647_v33 = vpop.f32.mrb[3].mxu0  ;;  %v2513_v34 = vadd.f32 %v1582_v31, %v1115_v32 }
 0x1be   : > { %652 = vrot.lane.b32.xlu0 %v645_v30, %s2134_s11  ;;  %655 = vrot.lane.b32.xlu1 %v645_v30, %s2132_s21 }
 0x1c2   : > { %1123 = vrot.lane.b32.xlu1 %v2513_v34, %s2134_s11  ;;  %1120 = vrot.lane.b32.xlu0 %v2513_v34, %s2133_s15 }
 0x1c6   : > { %1126 = vrot.lane.b32.xlu0 %v2513_v34, %s2132_s21  ;;  %s1969_s21 = sshll.u32 %s2137_s1, 4  ;;  %s1970_s21 = int_to_ptr.vmem [resolvable:$false] %s1969_s21 }
 0x1c7   : > { %s1971_s15 = scalar_lea.vmem %s1970_s21, 1024  ;;  %p1972_p13 = scmp.lt.s32.totalorder %s2565_s4, %s1970_s21 }
 0x1c8   : > { %p1973_p6 = scmp.lt.s32.totalorder %s1971_s15, %s1965_s17 }
 0x1ca   : > { %p1974_p0 = por %p1973_p6, %p1972_p13 }
 0x1cc   : > { %p1975_p12 = pnand %p1974_p0, %p1968_p1 }
 0x228   : > { %v892_v42 = vpop.permute.xlu1 %891  ;;  %v886_v43 = vpop.permute.xlu0 %885 }
 0x229   : > { %v910_v46 = vcombine.low %v886_v43, %v892_v42  ;;  %v911_v47 = vcombine.high %v886_v43, %v892_v42 }
 0x22b   : > { %v918_v53 = vrot.slane %v910_v46, %v2518_v45  ;;  %v925_v54 = vrot.slane %v911_v47, %v2518_v45 }
 0x22c   : > { %v889_v48 = vpop.permute.xlu0 %888  ;;  %v650_v49 = vpop.permute.xlu1 %649 }
 0x22d   : > { %v894_v50 = vcombine.low %v881_v26, %v889_v48  ;;  %v895_v51 = vcombine.high %v881_v26, %v889_v48 }
 0x22f   : > { %v902_v55 = vrot.slane %v894_v50, %v2518_v45  ;;  %v909_v56 = vrot.slane %v895_v51, %v2518_v45 }
 0x230   : > { %v653_v57 = vpop.permute.xlu0 %652  ;;  %v656_v58 = vpop.permute.xlu1 %655 }
 0x231   : > { %v926_v59 = vcombine.low %v902_v55, %v918_v53  ;;  %v927_v60 = vcombine.high %v902_v55, %v918_v53  ;;  %v942_v61 = vcombine.low %v909_v56, %v925_v54  ;;  %v943_v62 = vcombine.high %v909_v56, %v925_v54 }
 0x232   : > { %v658_v63 = vcombine.low %v645_v30, %v653_v57  ;;  %v659_v0 = vcombine.high %v645_v30, %v653_v57  ;;  %v674_v1 = vcombine.low %v650_v49, %v656_v58  ;;  %v675_v2 = vcombine.high %v650_v49, %v656_v58 }
 0x233   : > { %v934_v3 = vrot.slane %v926_v59, %v2520_v52  ;;  %v941_v4 = vrot.slane %v927_v60, %v2520_v52  ;;  %v950_v5 = vrot.slane %v942_v61, %v2520_v52  ;;  %v957_v6 = vrot.slane %v943_v62, %v2520_v52 }
 0x234   : > { %v666_v7 = vrot.slane %v658_v63, %v2518_v45  ;;  %v673_v8 = vrot.slane %v659_v0, %v2518_v45  ;;  %v682_v9 = vrot.slane %v674_v1, %v2518_v45  ;;  %v689_v10 = vrot.slane %v675_v2, %v2518_v45  ;;  %v2534_v19 = vpop.permute.xlu0 %1120  ;;  %v1124_v46 = vpop.permute.xlu1 %1123 }
 0x235   : > { %v962_v11 = vcombine.low %v934_v3, %v941_v4  ;;  %v1580_v12 = vcombine.high %v934_v3, %v941_v4  ;;  %v978_v13 = vcombine.low %v950_v5, %v957_v6  ;;  %v1581_v14 = vcombine.high %v950_v5, %v957_v6 }
 0x236   : > { %v690_v15 = vcombine.low %v666_v7, %v682_v9  ;;  %v691_v16 = vcombine.high %v666_v7, %v682_v9  ;;  %v706_v17 = vcombine.low %v673_v8, %v689_v10  ;;  %v707_v18 = vcombine.high %v673_v8, %v689_v10 }
 0x237   : > { %v969_v20 = vrot.slane %v962_v11, %v2518_v45  ;;  %v977_v21 = vrot.slane %v1580_v12, %v2518_v45  ;;  %v985_v22 = vrot.slane %v978_v13, %v2518_v45  ;;  %v993_v23 = vrot.slane %v1581_v14, %v2518_v45 }
 0x238   : > { %v698_v24 = vrot.slane %v690_v15, %v2520_v52  ;;  %v705_v25 = vrot.slane %v691_v16, %v2520_v52  ;;  %v714_v26 = vrot.slane %v706_v17, %v2520_v52  ;;  %v721_v27 = vrot.slane %v707_v18, %v2520_v52  ;;  %v1127_v47 = vpop.permute.xlu0 %1126 }
 0x239   : > { %v994_v28 = vcombine.low %v969_v20, %v977_v21  ;;  %v995_v29 = vcombine.high %v969_v20, %v977_v21  ;;  %v1010_v30 = vcombine.low %v985_v22, %v993_v23  ;;  %v1011_v31 = vcombine.high %v985_v22, %v993_v23 }
 0x23a   : > { %v726_v32 = vcombine.low %v698_v24, %v705_v25  ;;  %v1576_v33 = vcombine.high %v698_v24, %v705_v25  ;;  %v742_v35 = vcombine.low %v714_v26, %v721_v27  ;;  %v1577_v36 = vcombine.high %v714_v26, %v721_v27 }
 0x23b   : > { %v1002_v37 = vrot.slane %v994_v28, %v2520_v52  ;;  %v1009_v38 = vrot.slane %v995_v29, %v2520_v52  ;;  %v1018_v39 = vrot.slane %v1010_v30, %v2520_v52  ;;  %v1025_v40 = vrot.slane %v1011_v31, %v2520_v52 }
 0x23c   : > { %v733_v41 = vrot.slane %v726_v32, %v2518_v45  ;;  %v741_v42 = vrot.slane %v1576_v33, %v2518_v45  ;;  %v749_v43 = vrot.slane %v742_v35, %v2518_v45  ;;  %v757_v44 = vrot.slane %v1577_v36, %v2518_v45 }
 0x23d   : > { %v1026_v48 = vcombine.low %v1002_v37, %v1018_v39  ;;  %v1027_v49 = vcombine.high %v1002_v37, %v1018_v39  ;;  %v1028_v50 = vcombine.low %v1009_v38, %v1025_v40  ;;  %v1029_v51 = vcombine.high %v1009_v38, %v1025_v40 }
 0x23e   : > { %v758_v53 = vcombine.low %v733_v41, %v741_v42  ;;  %v759_v54 = vcombine.high %v733_v41, %v741_v42  ;;  %v774_v55 = vcombine.low %v749_v43, %v757_v44  ;;  %v775_v56 = vcombine.high %v749_v43, %v757_v44 }
 0x23f   : > { %v1129_v57 = vcombine.low %v2513_v34, %v1124_v46  ;;  %v1130_v58 = vcombine.high %v2513_v34, %v1124_v46  ;;  %v1145_v59 = vcombine.low %v2534_v19, %v1127_v47  ;;  %v1146_v60 = vcombine.high %v2534_v19, %v1127_v47  ;;  %1030 = vst.msk [vmem:[%s554_s14] sm:$0xff] %vm794_vm2, %v1026_v48 }
 0x240   : > { %1031 = vst.msk [vmem:[%s554_s14 + $0x8] sm:$0xff] %vm794_vm2, %v1027_v49  ;;  %1032 = vst.msk [vmem:[%s554_s14 + $0x10] sm:$0xff] %vm794_vm2, %v1028_v50  ;;  %v766_v34 = vrot.slane %v758_v53, %v2520_v52  ;;  %v773_v61 = vrot.slane %v759_v54, %v2520_v52  ;;  %v782_v62 = vrot.slane %v774_v55, %v2520_v52 }
 0x241   : > { %1033 = vst.msk [vmem:[%s554_s14 + $0x18] sm:$0xff] %vm794_vm2, %v1029_v51  ;;  %v789_v63 = vrot.slane %v775_v56, %v2520_v52 }
 0x242   : > { %1978 = shalt.err (!%p1975_p12)
}
 0x243   : > { %s1979_s23 = scalar_lea.hbm %s2563_s24, 512  ;;  %s1983_s13 = scalar_lea.hbm %s2820_s27, 1024 }
 0x244   : > { %p1980_p8 = scmp.ne.s32.totalorder %s2563_s24, %s1979_s23  ;;  %p1984_p5 = scmp.lt.u32.totalorder %s2563_s24, %s2820_s27 }
 0x245   : > { %p1985_p9 = scmp.lt.u32.totalorder %s1983_s13, %s1979_s23  ;;  %p1987_p4 = scmp.lt.u32.totalorder %s1979_s23, %s2563_s24 }
 0x246   : > { %p1981_p11 = pnand %p1980_p8, %p2822_p7 }
 0x247   : > { %p1986_p2 = por %p1985_p9, %p1984_p5 }
 0x248   : > { %p1982_p10 = pneg %p1981_p11 }
 0x249   : > { %p1988_p3 = por %p1987_p4, %p1986_p2 }
 0x24b   : > { %p1989_p1 = pnand %p1988_p3, %p1982_p10 }
 0x24d   : > { %1992 = shalt.err (!%p1989_p1)
}
 0x24e   : > { %s2138_s26 = smov 128   ;;  %s2139_s14 = smov 8   ;;  %v1137_v0 = vrot.slane %v1129_v57, %v2518_v45  ;;  %v1144_v1 = vrot.slane %v1130_v58, %v2518_v45  ;;  %v1153_v2 = vrot.slane %v1145_v59, %v2518_v45  ;;  %v1160_v3 = vrot.slane %v1146_v60, %v2518_v45 }
 0x24f   : > { %1685 = dma.vmem_to_hbm [thread:$0]  (%p2822_p7), %s2565_s4, 512, %s2563_s24, %s2585_s16, %s2138_s26, %s2138_s26, %s2139_s14   ;;  %v790_v4 = vcombine.low %v766_v34, %v782_v62  ;;  %v791_v5 = vcombine.high %v766_v34, %v782_v62  ;;  %v792_v6 = vcombine.low %v773_v61, %v789_v63  ;;  %v793_v7 = vcombine.high %v773_v61, %v789_v63 }
 0x250   : > { %s2823_s17 = sld [smem:[#allocation35_spill]]  ;;  %v1161_v8 = vcombine.low %v1137_v0, %v1153_v2  ;;  %v1162_v9 = vcombine.high %v1137_v0, %v1153_v2  ;;  %v1177_v10 = vcombine.low %v1144_v1, %v1160_v3  ;;  %v1178_v11 = vcombine.high %v1144_v1, %v1160_v3  ;;  %s1270_s24 = scalar_lea.sflag [#allocation4], %s2464_s3 }
 0x251   : > { %795 = vst.msk [vmem:[%s2576_s25] sm:$0xff] %vm794_vm2, %v790_v4  ;;  %796 = vst.msk [vmem:[%s2576_s25 + $0x8] sm:$0xff] %vm794_vm2, %v791_v5  ;;  %s1993_s21 = scalar_lea.vmem %s2624_s30, 512  ;;  %s2140_s15 = smov [#allocation13]  }
 0x252   : > { %797 = vst.msk [vmem:[%s2576_s25 + $0x10] sm:$0xff] %vm794_vm2, %v792_v6  ;;  %798 = vst.msk [vmem:[%s2576_s25 + $0x18] sm:$0xff] %vm794_vm2, %v793_v7  ;;  %v1169_v12 = vrot.slane %v1161_v8, %v2520_v52  ;;  %v1176_v13 = vrot.slane %v1162_v9, %v2520_v52  ;;  %v1185_v14 = vrot.slane %v1177_v10, %v2520_v52  ;;  %p1994_p13 = scmp.ne.s32.totalorder %s2624_s30, %s1993_s21  ;;  %s1997_s23 = sshll.u32 %s2140_s15, 4  ;;  %s1998_s23 = int_to_ptr.vmem [resolvable:$false] %s1997_s23 }
 0x253   : > { %v1192_v15 = vrot.slane %v1178_v11, %v2520_v52  ;;  %s1999_s9 = scalar_lea.vmem %s1998_s23, 1024  ;;  %p2000_p12 = scmp.lt.s32.totalorder %s2624_s30, %s1998_s23 }
 0x254   : > { %p1995_p6 = pnand %p1994_p13, %p2822_p7  ;;  %p2001_p8 = scmp.lt.s32.totalorder %s1999_s9, %s1993_s21 }
 0x256   : > { %s2824_s1 = smov %s2823_s17  ;;  %s2620_s4 = scalar_lea.hbm %s2823_s17, %s2548_s10 }
 0x257   : > { %p1996_p0 = pneg %p1995_p6  ;;  %p2002_p11 = por %p2001_p8, %p2000_p12 }
 0x259   : > { %p2003_p10 = pnand %p2002_p11, %p1996_p0 }
 0x25b   : > { %2006 = shalt.err (!%p2003_p10)
}
 0x25c   : > { %s2007_s25 = scalar_lea.hbm %s2620_s4, 512  ;;  %s2011_s22 = scalar_lea.hbm %s2824_s1, 1024 }
 0x25d   : > { %p2008_p5 = scmp.ne.s32.totalorder %s2620_s4, %s2007_s25  ;;  %p2012_p4 = scmp.lt.u32.totalorder %s2620_s4, %s2824_s1 }
 0x25e   : > { %p2013_p3 = scmp.lt.u32.totalorder %s2011_s22, %s2007_s25  ;;  %p2015_p13 = scmp.lt.u32.totalorder %s2007_s25, %s2620_s4 }
 0x25f   : > { %p2009_p9 = pnand %p2008_p5, %p2822_p7 }
 0x260   : > { %p2014_p1 = por %p2013_p3, %p2012_p4 }
 0x261   : > { %p2010_p2 = pneg %p2009_p9 }
 0x262   : > { %p2016_p6 = por %p2015_p13, %p2014_p1 }
 0x264   : > { %p2017_p0 = pnand %p2016_p6, %p2010_p2 }
 0x266   : > { %2020 = shalt.err (!%p2017_p0)
}
 0x267   : > { %1684 = dma.vmem_to_hbm [thread:$0]  (%p2822_p7), %s2624_s30, 512, %s2620_s4, %s1270_s24, %s2138_s26, %s2138_s26, %s2139_s14   ;;  %v1197_v16 = vcombine.low %v1169_v12, %v1176_v13  ;;  %v1584_v17 = vcombine.high %v1169_v12, %v1176_v13  ;;  %v1213_v18 = vcombine.low %v1185_v14, %v1192_v15  ;;  %v1585_v19 = vcombine.high %v1185_v14, %v1192_v15 }
 0x268   : > { %s561_s3 = scalar_lea.vmem [#allocation16], %s2537_s29  ;;  %s2825_s4 = sld [smem:[#allocation37_spill]] }
 0x269   : > { %v1204_v20 = vrot.slane %v1197_v16, %v2518_v45  ;;  %v1212_v21 = vrot.slane %v1584_v17, %v2518_v45  ;;  %v1220_v22 = vrot.slane %v1213_v18, %v2518_v45  ;;  %v1228_v23 = vrot.slane %v1585_v19, %v2518_v45  ;;  %s1328_s20 = sshll.u32 %s561_s3, 4  ;;  %s2680_s20 = int_to_ptr.vmem [resolvable:$true] %s1328_s20 }
 0x26a   : > { %s2021_s29 = scalar_lea.vmem %s2680_s20, 512 }
 0x26b   : > { %v1229_v24 = vcombine.low %v1204_v20, %v1212_v21  ;;  %v1230_v25 = vcombine.high %v1204_v20, %v1212_v21  ;;  %v1245_v26 = vcombine.low %v1220_v22, %v1228_v23  ;;  %v1246_v27 = vcombine.high %v1220_v22, %v1228_v23  ;;  %p2022_p12 = scmp.ne.s32.totalorder %s2680_s20, %s2021_s29 }
 0x26d   : > { %v1237_v28 = vrot.slane %v1229_v24, %v2520_v52  ;;  %v1244_v29 = vrot.slane %v1230_v25, %v2520_v52  ;;  %v1253_v30 = vrot.slane %v1245_v26, %v2520_v52  ;;  %v1260_v31 = vrot.slane %v1246_v27, %v2520_v52  ;;  %p2023_p8 = pnand %p2022_p12, %p2822_p7 }
 0x26e   : > { %s2678_s24 = scalar_lea.hbm %s2825_s4, %s2548_s10  ;;  %s2141_s10 = smov [#allocation16]  }
 0x26f   : > { %v1261_v32 = vcombine.low %v1237_v28, %v1253_v30  ;;  %v1262_v33 = vcombine.high %v1237_v28, %v1253_v30  ;;  %v1263_v35 = vcombine.low %v1244_v29, %v1260_v31  ;;  %v1264_v36 = vcombine.high %v1244_v29, %v1260_v31  ;;  %p2024_p11 = pneg %p2023_p8  ;;  %s2025_s21 = sshll.u32 %s2141_s10, 4  ;;  %s2026_s21 = int_to_ptr.vmem [resolvable:$false] %s2025_s21 }
 0x270   : > { %s2027_s15 = scalar_lea.vmem %s2026_s21, 1024  ;;  %p2028_p10 = scmp.lt.s32.totalorder %s2680_s20, %s2026_s21 }
 0x271   : > { %1265 = vst.msk [vmem:[%s561_s3] sm:$0xff] %vm794_vm2, %v1261_v32  ;;  %1266 = vst.msk [vmem:[%s561_s3 + $0x8] sm:$0xff] %vm794_vm2, %v1262_v33  ;;  %p2029_p5 = scmp.lt.s32.totalorder %s2027_s15, %s2021_s29 }
 0x272   : > { %1267 = vst.msk [vmem:[%s561_s3 + $0x10] sm:$0xff] %vm794_vm2, %v1263_v35  ;;  %1268 = vst.msk [vmem:[%s561_s3 + $0x18] sm:$0xff] %vm794_vm2, %v1264_v36 }
 0x273   : > { %p2030_p9 = por %p2029_p5, %p2028_p10 }
 0x275   : > { %p2031_p2 = pnand %p2030_p9, %p2024_p11 }
 0x277   : > { %2034 = shalt.err (!%p2031_p2)
}
 0x278   : > { %s2035_s23 = scalar_lea.hbm %s2678_s24, 512  ;;  %s2039_s11 = scalar_lea.hbm %s2825_s4, 1024 }
 0x279   : > { %p2036_p4 = scmp.ne.s32.totalorder %s2678_s24, %s2035_s23  ;;  %p2040_p13 = scmp.lt.u32.totalorder %s2678_s24, %s2825_s4 }
 0x27a   : > { %p2041_p6 = scmp.lt.u32.totalorder %s2039_s11, %s2035_s23  ;;  %p2043_p12 = scmp.lt.u32.totalorder %s2035_s23, %s2678_s24 }
 0x27b   : > { %p2037_p3 = pnand %p2036_p4, %p2822_p7 }
 0x27c   : > { %p2042_p0 = por %p2041_p6, %p2040_p13 }
 0x27d   : > { %p2038_p1 = pneg %p2037_p3 }
 0x27e   : > { %p2044_p8 = por %p2043_p12, %p2042_p0 }
 0x280   : > { %p2045_p11 = pnand %p2044_p8, %p2038_p1 }
 0x282   : > { %2048 = shalt.err (!%p2045_p11)
}
 0x283   : > { %1686 = dma.vmem_to_hbm [thread:$0]  (%p2822_p7), %s2680_s20, 512, %s2678_s24, %s2585_s16, %s2138_s26, %s2138_s26, %s2139_s14  }
 0x284 PF: > { %s2826_s12 = sld [smem:[#allocation23_spill]]  ;;  %s2827_s8 = sld [smem:[#allocation27_spill]] }
 0x285   : > { %s2828_s3 = sld [smem:[#allocation26_spill]] }
 0x28a   : > { %s1343_s30 = sand.u32 1, %s2826_s12   ;;  %p2829_p10 = scmp.ne.s32.totalorder %s2827_s8, 0 }
 0x28b   : > { %p2830_p5 = scmp.ge.s32.totalorder %s2828_s3, 2  ;;  %s1344_s17 = scalar_lea.sflag [#allocation4], %s1343_s30 }
 0x28d   : > { %p1711_p9 = pnand %p2830_p5, %p2829_p10 }
 0x28f   : > { %2090 = dma.done.wait (!%p1711_p9), %s1344_s17, 512  }
 0x290   : > { %2092 = vsyncadd (!%p1711_p9), %s1344_s17, 4294966784  ;;  %s2831_s28 = sadd.s32 4294967294, %s2828_s3  }
 0x291   : > { %s1352_s29 = sand.u32 1, %s2831_s28  }
 0x292   : > { %s1353_s10 = scalar_lea.sflag [#allocation15], %s1352_s29 }
 0x293   : > { %2094 = dma.done.wait (!%p1711_p9), %s1353_s10, 1024  }
 0x294   : > { %2096 = vsyncadd (!%p1711_p9), %s1353_s10, 4294966272  ;;  %s36_s22 = sadd.s32 1, %s2828_s3   ;;  %s2832_s16 = sld [smem:[#allocation30_spill]] }
 0x295   : > { %p33_p7 = scmp.ge.s32.totalorder %s36_s22, 4   ;;  %s2833_s20 = sld [smem:[#allocation25_spill]] }
 0x296   : > { %s2834_s21 = sld [smem:[#allocation28_spill]]  ;;  %s2835_s17 = smov %s2103_s18 }
 0x297   : > { %s2836_s18 = smov %s2107_s19  ;;  %35 = sbr.rel (!%p33_p7) target bundleno = 20 (0x14), region = 169 }
 0x29a   : > { %s2837_s19 = smov %s2832_s16 }
 0x29e   :  { %1367 = vsyncpa [#allocation3], 1 }
 0x29f   :  { %1369 = vsyncpa [#allocation3 + $0x1], 1 }
 0x2a0   :  { %1370 = vsyncpa [#allocation6], 1 }
 0x2a1   :  { %1372 = vsyncpa [#allocation6 + $0x1], 1 }
 0x2a2   :  { %1373 = vsyncpa [#allocation9], 1 }
 0x2a3   :  { %1374 = vsyncpa [#allocation12], 1 }
 0x2a4   :  { %1375 = vsyncpa [#allocation4], 1 }
 0x2a5   :  { %1377 = vsyncpa [#allocation4 + $0x1], 1 }
 0x2a6   :  { %1378 = vsyncpa [#allocation15], 1 }
 0x2a7   :  { %1380 = vsyncpa [#allocation15 + $0x1], 1 }

</bundles_post_ra>
